<compile_context>
chip_gen: v5e
topology: v5e:2x2
jax: 0.10.0
libtpu: 0.0.40
codegen_flags: <defaults>
</compile_context>

<pallas_src>
import functools

import jax
import jax.numpy as jnp
from jax.experimental import pallas as pl
from jax.experimental.pallas import tpu as pltpu

LN_EPS = 1e-5            # torch.nn.LayerNorm default
MASK_BIAS = -1e9         # additive bias for masked key positions (Python float)
MXU_DTYPE = jnp.bfloat16

# Tile targets (sweepable).  Dims <= target use one full-extent block.
MM_TM = 256
MM_TN = 512
MM_TK = 256
ATTN_TQ = 128


# ------------------------------ small helpers --------------------------------

def _round_up(x, m):
    return (x + m - 1) // m * m


def _tile_and_pad(dim, target):
    """Tile size and padded extent for a dimension.

    dim <= target : one full-extent block (no padding).
    dim  > target : tile = target, pad dim up to a multiple of target.
    """
    if dim <= target:
        return dim, dim
    return target, _round_up(dim, target)


def _pad_axis(x, axis, size):
    pad = size - x.shape[axis]
    if pad <= 0:
        return x
    widths = [(0, 0)] * x.ndim
    widths[axis] = (0, pad)
    return jnp.pad(x, widths)


# ------------------------------ Pallas kernels --------------------------------

def _matmul_bias_kernel(x_ref, w_ref, b_ref, o_ref, acc_ref, *, relu):
    """o = (relu)(x @ w + b), tiled over (M, N, K) with f32 accumulation."""
    @pl.when(pl.program_id(2) == 0)
    def _():
        acc_ref[...] = jnp.zeros_like(acc_ref)

    a = x_ref[...]
    if a.dtype != MXU_DTYPE:
        a = a.astype(MXU_DTYPE)          # cast at MXU input; no wrapper-side copy
    acc_ref[...] += jnp.dot(a, w_ref[...], preferred_element_type=jnp.float32)

    @pl.when(pl.program_id(2) == pl.num_programs(2) - 1)
    def _():
        r = acc_ref[...] + b_ref[...].astype(jnp.float32)
        if relu:
            r = jnp.maximum(r, 0.0)
        o_ref[...] = r.astype(o_ref.dtype)


def _matmul_res_ln_kernel(x_ref, w_ref, b_ref, res_ref, g_ref, bt_ref,
                          o_ref, acc_ref):
    """o = LayerNorm(x @ w + b + residual); N (= d_model) kept whole per block."""
    @pl.when(pl.program_id(1) == 0)
    def _():
        acc_ref[...] = jnp.zeros_like(acc_ref)

    a = x_ref[...]
    if a.dtype != MXU_DTYPE:
        a = a.astype(MXU_DTYPE)
    acc_ref[...] += jnp.dot(a, w_ref[...], preferred_element_type=jnp.float32)

    @pl.when(pl.program_id(1) == pl.num_programs(1) - 1)
    def _():
        y = (acc_ref[...] + b_ref[...].astype(jnp.float32)
             + res_ref[...].astype(jnp.float32))
        mu = jnp.mean(y, axis=-1, keepdims=True)
        var = jnp.mean(jnp.square(y - mu), axis=-1, keepdims=True)
        yn = (y - mu) * jax.lax.rsqrt(var + LN_EPS)
        o_ref[...] = (yn * g_ref[...].astype(jnp.float32)
                      + bt_ref[...].astype(jnp.float32)).astype(o_ref.dtype)


def _mha_kernel(q_ref, k_ref, v_ref, bias_ref, o_ref):
    """One (batch, head, query-tile) attention step.

    q already carries the 1/sqrt(d_k) scale (folded into wq/bq at init);
    the mask arrives as an additive bias, so the inner loop is
    matmul -> add -> softmax -> matmul with no compare/select or scale mul.
    """
    q = q_ref[0, 0]                      # (tq, d_k)  bf16
    k = k_ref[0, 0]                      # (S,  d_k)  bf16
    v = v_ref[0, 0]                      # (S,  d_v)  bf16

    # Contract the feature dims of q and k directly (no explicit transpose).
    s = jax.lax.dot_general(q, k, (((1,), (1,)), ((), ())),
                            preferred_element_type=jnp.float32)
    s = s + bias_ref[0].astype(jnp.float32)          # (tq, S) additive mask
    s = s - jnp.max(s, axis=-1, keepdims=True)
    p = jnp.exp(s)
    p = p / jnp.sum(p, axis=-1, keepdims=True)       # exact denom
    o_ref[0, 0] = jnp.dot(p.astype(v.dtype), v,
                          preferred_element_type=jnp.float32).astype(o_ref.dtype)


# -------------------------------- wrappers ------------------------------------

def pallas_matmul_bias(x, w, b, *, relu=False, out_dtype=None,
                       tm_target=MM_TM, tn_target=MM_TN, tk_target=MM_TK):
    """Tiled (M,N,K) matmul + bias (+ReLU).  Used for fused QKV and FFN-1."""
    M, K = x.shape
    _, N = w.shape
    out_dtype = out_dtype or x.dtype

    tm, Mp = _tile_and_pad(M, tm_target)
    tn, Np = _tile_and_pad(N, tn_target)
    tk, Kp = _tile_and_pad(K, tk_target)

    xp = _pad_axis(_pad_axis(x, 0, Mp), 1, Kp)
    wp = _pad_axis(_pad_axis(w, 0, Kp), 1, Np)
    bp = _pad_axis(b.reshape(1, N), 1, Np)

    out = pl.pallas_call(
        functools.partial(_matmul_bias_kernel, relu=relu),
        out_shape=jax.ShapeDtypeStruct((Mp, Np), out_dtype),
        grid=(Mp // tm, Np // tn, Kp // tk),
        in_specs=[
            pl.BlockSpec((tm, tk), lambda i, j, k: (i, k)),
            pl.BlockSpec((tk, tn), lambda i, j, k: (k, j)),
            pl.BlockSpec((1, tn), lambda i, j, k: (0, j)),
        ],
        out_specs=pl.BlockSpec((tm, tn), lambda i, j, k: (i, j)),
        scratch_shapes=[pltpu.VMEM((tm, tn), jnp.float32)],
        compiler_params=pltpu.CompilerParams(
            dimension_semantics=("parallel", "parallel", "arbitrary")),
    )(xp, wp, bp)
    if Mp == M and Np == N:
        return out
    return out[:M, :N]


def pallas_matmul_residual_layernorm(x, w, b, residual, gamma, beta, *,
                                     out_dtype=None, tm_target=MM_TM,
                                     tk_target=MM_TK):
    """Tiled (M,K) matmul with fused bias + residual add + LayerNorm epilogue."""
    M, K = x.shape
    _, N = w.shape                       # N = d_model (LayerNorm axis, kept whole)
    out_dtype = out_dtype or residual.dtype

    tm, Mp = _tile_and_pad(M, tm_target)
    tk, Kp = _tile_and_pad(K, tk_target)

    xp = _pad_axis(_pad_axis(x, 0, Mp), 1, Kp)
    wp = _pad_axis(w, 0, Kp)
    resp = _pad_axis(residual, 0, Mp)

    out = pl.pallas_call(
        _matmul_res_ln_kernel,
        out_shape=jax.ShapeDtypeStruct((Mp, N), out_dtype),
        grid=(Mp // tm, Kp // tk),
        in_specs=[
            pl.BlockSpec((tm, tk), lambda i, k: (i, k)),
            pl.BlockSpec((tk, N), lambda i, k: (k, 0)),
            pl.BlockSpec((1, N), lambda i, k: (0, 0)),       # bias  (constant)
            pl.BlockSpec((tm, N), lambda i, k: (i, 0)),      # residual
            pl.BlockSpec((1, N), lambda i, k: (0, 0)),       # gamma (constant)
            pl.BlockSpec((1, N), lambda i, k: (0, 0)),       # beta  (constant)
        ],
        out_specs=pl.BlockSpec((tm, N), lambda i, k: (i, 0)),
        scratch_shapes=[pltpu.VMEM((tm, N), jnp.float32)],
        compiler_params=pltpu.CompilerParams(
            dimension_semantics=("parallel", "arbitrary")),
    )(xp, wp, b.reshape(1, N), resp, gamma.reshape(1, N), beta.reshape(1, N))
    if Mp == M:
        return out
    return out[:M]


def pallas_attention(q, k, v, attn_bias, *, n_head, d_k, d_v, tq_target=ATTN_TQ):
    """Multi-head attention with a (batch, head, query-tile) grid.

    q, k: (B, S, H*d_k)   v: (B, S, H*d_v)
    attn_bias: (B, Sp, Sp) additive mask bias (0 keep / -1e9 drop), already
               padded and shared by all heads/layers.
    """
    B, S, _ = q.shape
    tq, Sp = _tile_and_pad(S, tq_target)
    assert attn_bias.shape == (B, Sp, Sp)

    def split_heads(t, d):
        # pad S (padded keys are masked via attn_bias), split heads, head-major.
        t = _pad_axis(t, 1, Sp)
        return t.reshape(B, Sp, n_head, d).transpose(0, 2, 1, 3)   # (B,H,Sp,d)

    qh = split_heads(q, d_k)
    kh = split_heads(k, d_k)
    vh = split_heads(v, d_v)

    out = pl.pallas_call(
        _mha_kernel,
        out_shape=jax.ShapeDtypeStruct((B, n_head, Sp, d_v), q.dtype),
        grid=(B, n_head, Sp // tq),
        in_specs=[
            pl.BlockSpec((1, 1, tq, d_k), lambda b, h, i: (b, h, i, 0)),
            pl.BlockSpec((1, 1, Sp, d_k), lambda b, h, i: (b, h, 0, 0)),
            pl.BlockSpec((1, 1, Sp, d_v), lambda b, h, i: (b, h, 0, 0)),
            pl.BlockSpec((1, tq, Sp), lambda b, h, i: (b, i, 0)),
        ],
        out_specs=pl.BlockSpec((1, 1, tq, d_v), lambda b, h, i: (b, h, i, 0)),
        compiler_params=pltpu.CompilerParams(
            dimension_semantics=("parallel", "parallel", "parallel")),
    )(qh, kh, vh, attn_bias)

    # back to (B, S, H*d_v), heads packed along the lane axis
    out = out.transpose(0, 2, 1, 3).reshape(B, Sp, n_head * d_v)
    if Sp == S:
        return out
    return out[:, :S]


# ------------------------------- model glue ------------------------------------

def init_bert_params(key, d_model, n_layers, d_k, d_v, n_head, d_inner):
    """Pre-fused / pre-cast parameters: QKV weights concatenated, MXU operands
    in bf16, 1/sqrt(d_k) folded into wq/bq.  Done once, not per forward."""
    params = []
    scale = 1.0 / (d_k ** 0.5)
    for _ in range(n_layers):
        keys = jax.random.split(key, 7)
        key = keys[0]
        std = 0.02
        wq = jax.random.normal(keys[1], (d_model, n_head * d_k), jnp.float32) * std
        wk = jax.random.normal(keys[2], (d_model, n_head * d_k), jnp.float32) * std
        wv = jax.random.normal(keys[3], (d_model, n_head * d_v), jnp.float32) * std
        wo = jax.random.normal(keys[4], (n_head * d_v, d_model), jnp.float32) * std
        w1 = jax.random.normal(keys[5], (d_model, d_inner), jnp.float32) * std
        w2 = jax.random.normal(keys[6], (d_inner, d_model), jnp.float32) * std
        bq = jnp.zeros((n_head * d_k,), jnp.float32)
        bk = jnp.zeros((n_head * d_k,), jnp.float32)
        bv = jnp.zeros((n_head * d_v,), jnp.float32)
        layer = dict(
            w_qkv=jnp.concatenate([wq * scale, wk, wv], axis=1).astype(MXU_DTYPE),
            b_qkv=jnp.concatenate([bq * scale, bk, bv], axis=0),
            wo=wo.astype(MXU_DTYPE),
            bo=jnp.zeros((d_model,), jnp.float32),
            ln1_g=jnp.ones((d_model,), jnp.float32),
            ln1_b=jnp.zeros((d_model,), jnp.float32),
            w1=w1.astype(MXU_DTYPE),
            b1=jnp.zeros((d_inner,), jnp.float32),
            w2=w2.astype(MXU_DTYPE),
            b2=jnp.zeros((d_model,), jnp.float32),
            ln2_g=jnp.ones((d_model,), jnp.float32),
            ln2_b=jnp.zeros((d_model,), jnp.float32),
        )
        params.append(layer)
    return params


def transformer_block(x, attn_bias, p, n_head, d_k, d_v):
    B, S, D = x.shape
    M = B * S
    x2 = x.reshape(M, D)                 # f32 residual stream

    # ---- fused QKV projection (weights pre-concatenated / pre-cast / pre-scaled)
    qkv = pallas_matmul_bias(x2, p["w_qkv"], p["b_qkv"], out_dtype=MXU_DTYPE)

    nq = n_head * d_k
    nv = n_head * d_v
    q = qkv[:, :nq].reshape(B, S, nq)
    k = qkv[:, nq:2 * nq].reshape(B, S, nq)
    v = qkv[:, 2 * nq:].reshape(B, S, nv)

    # ---- multi-head attention with (batch, head, query-tile) grid
    ctx = pallas_attention(q, k, v, attn_bias, n_head=n_head, d_k=d_k, d_v=d_v)
    ctx2 = ctx.reshape(M, nv)

    # ---- output projection + residual + LayerNorm (fused), f32 residual out
    x2 = pallas_matmul_residual_layernorm(
        ctx2, p["wo"], p["bo"], x2, p["ln1_g"], p["ln1_b"],
        out_dtype=jnp.float32)

    # ---- FFN: matmul+bias+ReLU, then matmul+bias+residual+LayerNorm (fused)
    h = pallas_matmul_bias(x2, p["w1"], p["b1"], relu=True, out_dtype=MXU_DTYPE)
    x2 = pallas_matmul_residual_layernorm(
        h, p["w2"], p["b2"], x2, p["ln2_g"], p["ln2_b"],
        out_dtype=jnp.float32)

    return x2.reshape(B, S, D)


def bert_forward(input_data, mask, params, n_head, d_k, d_v):
    # mirrors BERT.forward: only computes when mask is not None
    if mask is None:
        return None
    B, S, _ = input_data.shape
    _, Sp = _tile_and_pad(S, ATTN_TQ)

    # Additive mask bias, computed/padded ONCE per forward (layer-invariant):
    # mask > 0 -> 0.0 ; mask == 0 (incl. padded keys) -> -1e9.
    mpad = _pad_axis(_pad_axis(mask.astype(jnp.float32), 1, Sp), 2, Sp)
    attn_bias = jnp.where(mpad > 0, 0.0, MASK_BIAS).astype(MXU_DTYPE)

    output = input_data.astype(jnp.float32)   # residual stream stays f32
    for layer_params in params:
        output = transformer_block(output, attn_bias, layer_params,
                                   n_head, d_k, d_v)
    return output.astype(input_data.dtype)


# ---------------------------------- main ----------------------------------------

if __name__ == "__main__":
    # small, module-consistent shapes
    B, S = 2, 8
    d_model, n_layers, d_k, d_v, n_head, d_inner = 32, 2, 8, 8, 4, 64
    dropout = 0.0  # eval mode

    key = jax.random.PRNGKey(0)
    k_x, k_p = jax.random.split(key)

    x = jax.random.normal(k_x, (B, S, d_model), jnp.float32)

    # padding-style attention mask: sequence 0 full length, sequence 1 has 2 pad tokens
    key_valid = jnp.array([[1] * 8, [1] * 6 + [0] * 2], dtype=jnp.float32)  # (B, S)
    mask = jnp.broadcast_to(key_valid[:, None, :], (B, S, S))               # (B, S, S)

    params = init_bert_params(k_p, d_model, n_layers, d_k, d_v, n_head, d_inner)

    fwd = jax.jit(functools.partial(bert_forward, n_head=n_head, d_k=d_k, d_v=d_v))
    out = fwd(x, mask, params)
    out = jax.block_until_ready(out)

    assert out.shape == (B, S, d_model)
    assert bool(jnp.all(jnp.isfinite(out)))
    print("KERNEL_OK")
</pallas_src>

<mosaic_0001>
module attributes {stable_mosaic.version = 11 : i64} {
  func.func @_matmul_bias_kernel(%arg0: i32, %arg1: i32, %arg2: i32, %arg3: memref<16x32xf32, #tpu.memory_space<vmem>>, %arg4: memref<32x96xbf16, #tpu.memory_space<vmem>>, %arg5: memref<1x96xf32, #tpu.memory_space<vmem>>, %arg6: memref<16x96xbf16, #tpu.memory_space<vmem>>, %arg7: memref<16x96xf32, #tpu.memory_space<vmem>>) attributes {dimension_semantics = [#tpu.dimension_semantics<parallel>, #tpu.dimension_semantics<parallel>, #tpu.dimension_semantics<arbitrary>], iteration_bounds = array<i64: 1, 1, 1>, scalar_prefetch = 0 : i64, scratch_operands = 1 : i64, tpu.core_type = #tpu.core_type<tc>, window_params = [{transform_indices = @transform_0, window_bounds = array<i64: 16, 32>}, {transform_indices = @transform_1, window_bounds = array<i64: 32, 96>}, {transform_indices = @transform_2, window_bounds = array<i64: 1, 96>}, {transform_indices = @transform_3, window_bounds = array<i64: 16, 96>}]} {
    %c0_i32 = arith.constant 0 : i32
    %0 = arith.cmpi eq, %arg2, %c0_i32 : i32
    %1 = arith.extui %0 : i1 to i32
    %c0_i32_0 = arith.constant 0 : i32
    %2 = arith.cmpi ne, %1, %c0_i32_0 : i32
    scf.if %2 {
      %cst_10 = arith.constant 0.000000e+00 : f32
      %13 = vector.broadcast %cst_10 : f32 to vector<16x96xf32>
      %c0_11 = arith.constant 0 : index
      %c0_12 = arith.constant 0 : index
      %14 = vector.load %arg7[%c0_11, %c0_12] : memref<16x96xf32, #tpu.memory_space<vmem>>, vector<16x96xf32>
      tpu.vector_store %arg7[%c0_11, %c0_12], %13 {strides = array<i32>} : memref<16x96xf32, #tpu.memory_space<vmem>>, vector<16x96xf32>,
    } else {
    }
    %c0 = arith.constant 0 : index
    %c0_1 = arith.constant 0 : index
    %3 = vector.load %arg3[%c0, %c0_1] : memref<16x32xf32, #tpu.memory_space<vmem>>, vector<16x32xf32>
    %4 = arith.truncf %3 : vector<16x32xf32> to vector<16x32xbf16>
    %c0_2 = arith.constant 0 : index
    %c0_3 = arith.constant 0 : index
    %5 = vector.load %arg7[%c0_2, %c0_3] : memref<16x96xf32, #tpu.memory_space<vmem>>, vector<16x96xf32>
    %c0_4 = arith.constant 0 : index
    %c0_5 = arith.constant 0 : index
    %6 = vector.load %arg4[%c0_4, %c0_5] : memref<32x96xbf16, #tpu.memory_space<vmem>>, vector<32x96xbf16>
    %cst = arith.constant dense<0.000000e+00> : vector<16x96xf32>
    %7 = tpu.matmul %4, %6, %cst {dimension_numbers = #tpu.dot_dimension_numbers<[1], [0], [0], [1], [0, 0, 1, 1], [], []>} : vector<16x32xbf16>, vector<32x96xbf16>, vector<16x96xf32> -> vector<16x96xf32>
    %8 = arith.addf %5, %7 : vector<16x96xf32>
    %c0_6 = arith.constant 0 : index
    %c0_7 = arith.constant 0 : index
    %9 = vector.load %arg7[%c0_6, %c0_7] : memref<16x96xf32, #tpu.memory_space<vmem>>, vector<16x96xf32>
    tpu.vector_store %arg7[%c0_6, %c0_7], %8 {strides = array<i32>} : memref<16x96xf32, #tpu.memory_space<vmem>>, vector<16x96xf32>,
    %c0_i32_8 = arith.constant 0 : i32
    %10 = arith.cmpi eq, %arg2, %c0_i32_8 : i32
    %11 = arith.extui %10 : i1 to i32
    %c0_i32_9 = arith.constant 0 : i32
    %12 = arith.cmpi ne, %11, %c0_i32_9 : i32
    scf.if %12 {
      %c0_10 = arith.constant 0 : index
      %c0_11 = arith.constant 0 : index
      %13 = vector.load %arg7[%c0_10, %c0_11] : memref<16x96xf32, #tpu.memory_space<vmem>>, vector<16x96xf32>
      %c0_12 = arith.constant 0 : index
      %c0_13 = arith.constant 0 : index
      %14 = vector.load %arg5[%c0_12, %c0_13] : memref<1x96xf32, #tpu.memory_space<vmem>>, vector<1x96xf32>
      %15 = vector.broadcast %14 : vector<1x96xf32> to vector<16x96xf32>
      %16 = arith.addf %13, %15 : vector<16x96xf32>
      %17 = arith.truncf %16 : vector<16x96xf32> to vector<16x96xbf16>
      %c0_14 = arith.constant 0 : index
      %c0_15 = arith.constant 0 : index
      %18 = vector.load %arg6[%c0_14, %c0_15] : memref<16x96xbf16, #tpu.memory_space<vmem>>, vector<16x96xbf16>
      tpu.vector_store %arg6[%c0_14, %c0_15], %17 {strides = array<i32>} : memref<16x96xbf16, #tpu.memory_space<vmem>>, vector<16x96xbf16>,
    } else {
    }
    return
  }
  func.func @transform_0(%arg0: i32, %arg1: i32, %arg2: i32) -> (i32, i32) {
    %c0_i32 = arith.constant 0 : i32
    return %arg0, %arg2 : i32, i32
  }
  func.func @transform_1(%arg0: i32, %arg1: i32, %arg2: i32) -> (i32, i32) {
    %c0_i32 = arith.constant 0 : i32
    return %arg2, %arg1 : i32, i32
  }
  func.func @transform_2(%arg0: i32, %arg1: i32, %arg2: i32) -> (i32, i32) {
    %c0_i32 = arith.constant 0 : i32
    %c0_i32_0 = arith.constant 0 : i32
    return %c0_i32, %arg1 : i32, i32
  }
  func.func @transform_3(%arg0: i32, %arg1: i32, %arg2: i32) -> (i32, i32) {
    %c0_i32 = arith.constant 0 : i32
    return %arg0, %arg1 : i32, i32
  }
}

module attributes {stable_mosaic.version = 11 : i64} {
  func.func @_mha_kernel(%arg0: i32, %arg1: i32, %arg2: i32, %arg3: memref<1x1x8x8xbf16, #tpu.memory_space<vmem>>, %arg4: memref<1x1x8x8xbf16, #tpu.memory_space<vmem>>, %arg5: memref<1x1x8x8xbf16, #tpu.memory_space<vmem>>, %arg6: memref<1x8x8xbf16, #tpu.memory_space<vmem>>, %arg7: memref<1x1x8x8xbf16, #tpu.memory_space<vmem>>) attributes {dimension_semantics = [#tpu.dimension_semantics<parallel>, #tpu.dimension_semantics<parallel>, #tpu.dimension_semantics<parallel>], iteration_bounds = array<i64: 2, 4, 1>, scalar_prefetch = 0 : i64, scratch_operands = 0 : i64, tpu.core_type = #tpu.core_type<tc>, window_params = [{transform_indices = @transform_0, window_bounds = array<i64: 1, 1, 8, 8>}, {transform_indices = @transform_1, window_bounds = array<i64: 1, 1, 8, 8>}, {transform_indices = @transform_2, window_bounds = array<i64: 1, 1, 8, 8>}, {transform_indices = @transform_3, window_bounds = array<i64: 1, 8, 8>}, {transform_indices = @transform_4, window_bounds = array<i64: 1, 1, 8, 8>}]} {
    %c0 = arith.constant 0 : index
    %c0_0 = arith.constant 0 : index
    %c0_1 = arith.constant 0 : index
    %c0_2 = arith.constant 0 : index
    %0 = vector.load %arg3[%c0, %c0_0, %c0_1, %c0_2] : memref<1x1x8x8xbf16, #tpu.memory_space<vmem>>, vector<1x1x8x8xbf16>
    %1 = vector.shape_cast %0 : vector<1x1x8x8xbf16> to vector<8x8xbf16>
    %c0_3 = arith.constant 0 : index
    %c0_4 = arith.constant 0 : index
    %c0_5 = arith.constant 0 : index
    %c0_6 = arith.constant 0 : index
    %2 = vector.load %arg4[%c0_3, %c0_4, %c0_5, %c0_6] : memref<1x1x8x8xbf16, #tpu.memory_space<vmem>>, vector<1x1x8x8xbf16>
    %3 = vector.shape_cast %2 : vector<1x1x8x8xbf16> to vector<8x8xbf16>
    %c0_7 = arith.constant 0 : index
    %c0_8 = arith.constant 0 : index
    %c0_9 = arith.constant 0 : index
    %c0_10 = arith.constant 0 : index
    %4 = vector.load %arg5[%c0_7, %c0_8, %c0_9, %c0_10] : memref<1x1x8x8xbf16, #tpu.memory_space<vmem>>, vector<1x1x8x8xbf16>
    %5 = vector.shape_cast %4 : vector<1x1x8x8xbf16> to vector<8x8xbf16>
    %cst = arith.constant dense<0.000000e+00> : vector<8x8xf32>
    %6 = tpu.matmul %1, %3, %cst {dimension_numbers = #tpu.dot_dimension_numbers<[1], [1], [0], [0], [0, 0, 1, 0], [], []>} : vector<8x8xbf16>, vector<8x8xbf16>, vector<8x8xf32> -> vector<8x8xf32>
    %c0_11 = arith.constant 0 : index
    %c0_12 = arith.constant 0 : index
    %c0_13 = arith.constant 0 : index
    %7 = vector.load %arg6[%c0_11, %c0_12, %c0_13] : memref<1x8x8xbf16, #tpu.memory_space<vmem>>, vector<1x8x8xbf16>
    %8 = vector.shape_cast %7 : vector<1x8x8xbf16> to vector<8x8xbf16>
    %9 = arith.extf %8 : vector<8x8xbf16> to vector<8x8xf32>
    %10 = arith.addf %6, %9 : vector<8x8xf32>
    %cst_14 = arith.constant dense<0xFF800000> : vector<8xf32>
    %11 = vector.multi_reduction <maximumf>, %10, %cst_14 [1] : vector<8x8xf32> to vector<8xf32>
    %12 = vector.shape_cast %11 : vector<8xf32> to vector<8x1xf32>
    %13 = vector.broadcast %12 : vector<8x1xf32> to vector<8x8xf32>
    %14 = arith.subf %10, %13 : vector<8x8xf32>
    %15 = math.exp %14 : vector<8x8xf32>
    %cst_15 = arith.constant dense<0.000000e+00> : vector<8xf32>
    %16 = vector.multi_reduction <add>, %15, %cst_15 [1] : vector<8x8xf32> to vector<8xf32>
    %17 = vector.shape_cast %16 : vector<8xf32> to vector<8x1xf32>
    %18 = vector.broadcast %17 : vector<8x1xf32> to vector<8x8xf32>
    %19 = arith.divf %15, %18 : vector<8x8xf32>
    %20 = arith.truncf %19 : vector<8x8xf32> to vector<8x8xbf16>
    %cst_16 = arith.constant dense<0.000000e+00> : vector<8x8xf32>
    %21 = tpu.matmul %20, %5, %cst_16 {dimension_numbers = #tpu.dot_dimension_numbers<[1], [0], [0], [1], [0, 0, 1, 1], [], []>} : vector<8x8xbf16>, vector<8x8xbf16>, vector<8x8xf32> -> vector<8x8xf32>
    %22 = arith.truncf %21 : vector<8x8xf32> to vector<8x8xbf16>
    %c0_17 = arith.constant 0 : index
    %c0_18 = arith.constant 0 : index
    %c0_19 = arith.constant 0 : index
    %c0_20 = arith.constant 0 : index
    %23 = vector.load %arg7[%c0_17, %c0_18, %c0_19, %c0_20] : memref<1x1x8x8xbf16, #tpu.memory_space<vmem>>, vector<1x1x8x8xbf16>
    %24 = vector.shape_cast %23 : vector<1x1x8x8xbf16> to vector<8x8xbf16>
    %25 = vector.shape_cast %22 : vector<8x8xbf16> to vector<1x1x8x8xbf16>
    tpu.vector_store %arg7[%c0_17, %c0_18, %c0_19, %c0_20], %25 {strides = array<i32>} : memref<1x1x8x8xbf16, #tpu.memory_space<vmem>>, vector<1x1x8x8xbf16>,
    return
  }
  func.func @transform_0(%arg0: i32, %arg1: i32, %arg2: i32) -> (i32, i32, i32, i32) {
    %c0_i32 = arith.constant 0 : i32
    %c0_i32_0 = arith.constant 0 : i32
    return %arg0, %arg1, %arg2, %c0_i32 : i32, i32, i32, i32
  }
  func.func @transform_1(%arg0: i32, %arg1: i32, %arg2: i32) -> (i32, i32, i32, i32) {
    %c0_i32 = arith.constant 0 : i32
    %c0_i32_0 = arith.constant 0 : i32
    %c0_i32_1 = arith.constant 0 : i32
    return %arg0, %arg1, %c0_i32, %c0_i32_0 : i32, i32, i32, i32
  }
  func.func @transform_2(%arg0: i32, %arg1: i32, %arg2: i32) -> (i32, i32, i32, i32) {
    %c0_i32 = arith.constant 0 : i32
    %c0_i32_0 = arith.constant 0 : i32
    %c0_i32_1 = arith.constant 0 : i32
    return %arg0, %arg1, %c0_i32, %c0_i32_0 : i32, i32, i32, i32
  }
  func.func @transform_3(%arg0: i32, %arg1: i32, %arg2: i32) -> (i32, i32, i32) {
    %c0_i32 = arith.constant 0 : i32
    %c0_i32_0 = arith.constant 0 : i32
    return %arg0, %arg2, %c0_i32 : i32, i32, i32
  }
  func.func @transform_4(%arg0: i32, %arg1: i32, %arg2: i32) -> (i32, i32, i32, i32) {
    %c0_i32 = arith.constant 0 : i32
    %c0_i32_0 = arith.constant 0 : i32
    return %arg0, %arg1, %arg2, %c0_i32 : i32, i32, i32, i32
  }
}

module attributes {stable_mosaic.version = 11 : i64} {
  func.func @_matmul_res_ln_kernel(%arg0: i32, %arg1: i32, %arg2: memref<16x32xbf16, #tpu.memory_space<vmem>>, %arg3: memref<32x32xbf16, #tpu.memory_space<vmem>>, %arg4: memref<1x32xf32, #tpu.memory_space<vmem>>, %arg5: memref<16x32xf32, #tpu.memory_space<vmem>>, %arg6: memref<1x32xf32, #tpu.memory_space<vmem>>, %arg7: memref<1x32xf32, #tpu.memory_space<vmem>>, %arg8: memref<16x32xf32, #tpu.memory_space<vmem>>, %arg9: memref<16x32xf32, #tpu.memory_space<vmem>>) attributes {dimension_semantics = [#tpu.dimension_semantics<parallel>, #tpu.dimension_semantics<arbitrary>], iteration_bounds = array<i64: 1, 1>, scalar_prefetch = 0 : i64, scratch_operands = 1 : i64, tpu.core_type = #tpu.core_type<tc>, window_params = [{transform_indices = @transform_0, window_bounds = array<i64: 16, 32>}, {transform_indices = @transform_1, window_bounds = array<i64: 32, 32>}, {pipeline_mode = #tpu.pipeline_mode<synchronous>, transform_indices = @transform_2, window_bounds = array<i64: 1, 32>}, {transform_indices = @transform_3, window_bounds = array<i64: 16, 32>}, {pipeline_mode = #tpu.pipeline_mode<synchronous>, transform_indices = @transform_4, window_bounds = array<i64: 1, 32>}, {pipeline_mode = #tpu.pipeline_mode<synchronous>, transform_indices = @transform_5, window_bounds = array<i64: 1, 32>}, {transform_indices = @transform_6, window_bounds = array<i64: 16, 32>}]} {
    %c0_i32 = arith.constant 0 : i32
    %0 = arith.cmpi eq, %arg1, %c0_i32 : i32
    %1 = arith.extui %0 : i1 to i32
    %c0_i32_0 = arith.constant 0 : i32
    %2 = arith.cmpi ne, %1, %c0_i32_0 : i32
    scf.if %2 {
      %cst_10 = arith.constant 0.000000e+00 : f32
      %12 = vector.broadcast %cst_10 : f32 to vector<16x32xf32>
      %c0_11 = arith.constant 0 : index
      %c0_12 = arith.constant 0 : index
      %13 = vector.load %arg9[%c0_11, %c0_12] : memref<16x32xf32, #tpu.memory_space<vmem>>, vector<16x32xf32>
      tpu.vector_store %arg9[%c0_11, %c0_12], %12 {strides = array<i32>} : memref<16x32xf32, #tpu.memory_space<vmem>>, vector<16x32xf32>,
    } else {
    }
    %c0 = arith.constant 0 : index
    %c0_1 = arith.constant 0 : index
    %3 = vector.load %arg2[%c0, %c0_1] : memref<16x32xbf16, #tpu.memory_space<vmem>>, vector<16x32xbf16>
    %c0_2 = arith.constant 0 : index
    %c0_3 = arith.constant 0 : index
    %4 = vector.load %arg9[%c0_2, %c0_3] : memref<16x32xf32, #tpu.memory_space<vmem>>, vector<16x32xf32>
    %c0_4 = arith.constant 0 : index
    %c0_5 = arith.constant 0 : index
    %5 = vector.load %arg3[%c0_4, %c0_5] : memref<32x32xbf16, #tpu.memory_space<vmem>>, vector<32x32xbf16>
    %cst = arith.constant dense<0.000000e+00> : vector<16x32xf32>
    %6 = tpu.matmul %3, %5, %cst {dimension_numbers = #tpu.dot_dimension_numbers<[1], [0], [0], [1], [0, 0, 1, 1], [], []>} : vector<16x32xbf16>, vector<32x32xbf16>, vector<16x32xf32> -> vector<16x32xf32>
    %7 = arith.addf %4, %6 : vector<16x32xf32>
    %c0_6 = arith.constant 0 : index
    %c0_7 = arith.constant 0 : index
    %8 = vector.load %arg9[%c0_6, %c0_7] : memref<16x32xf32, #tpu.memory_space<vmem>>, vector<16x32xf32>
    tpu.vector_store %arg9[%c0_6, %c0_7], %7 {strides = array<i32>} : memref<16x32xf32, #tpu.memory_space<vmem>>, vector<16x32xf32>,
    %c0_i32_8 = arith.constant 0 : i32
    %9 = arith.cmpi eq, %arg1, %c0_i32_8 : i32
    %10 = arith.extui %9 : i1 to i32
    %c0_i32_9 = arith.constant 0 : i32
    %11 = arith.cmpi ne, %10, %c0_i32_9 : i32
    scf.if %11 {
      %c0_10 = arith.constant 0 : index
      %c0_11 = arith.constant 0 : index
      %12 = vector.load %arg9[%c0_10, %c0_11] : memref<16x32xf32, #tpu.memory_space<vmem>>, vector<16x32xf32>
      %c0_12 = arith.constant 0 : index
      %c0_13 = arith.constant 0 : index
      %13 = vector.load %arg4[%c0_12, %c0_13] : memref<1x32xf32, #tpu.memory_space<vmem>>, vector<1x32xf32>
      %14 = vector.broadcast %13 : vector<1x32xf32> to vector<16x32xf32>
      %15 = arith.addf %12, %14 : vector<16x32xf32>
      %c0_14 = arith.constant 0 : index
      %c0_15 = arith.constant 0 : index
      %16 = vector.load %arg5[%c0_14, %c0_15] : memref<16x32xf32, #tpu.memory_space<vmem>>, vector<16x32xf32>
      %17 = arith.addf %15, %16 : vector<16x32xf32>
      %cst_16 = arith.constant dense<0.000000e+00> : vector<16xf32>
      %18 = vector.multi_reduction <add>, %17, %cst_16 [1] : vector<16x32xf32> to vector<16xf32>
      %19 = vector.shape_cast %18 : vector<16xf32> to vector<16x1xf32>
      %cst_17 = arith.constant 3.200000e+01 : f32
      %20 = vector.broadcast %cst_17 : f32 to vector<16x1xf32>
      %21 = arith.divf %19, %20 : vector<16x1xf32>
      %22 = vector.broadcast %21 : vector<16x1xf32> to vector<16x32xf32>
      %23 = arith.subf %17, %22 : vector<16x32xf32>
      %24 = arith.mulf %23, %23 : vector<16x32xf32>
      %cst_18 = arith.constant dense<0.000000e+00> : vector<16xf32>
      %25 = vector.multi_reduction <add>, %24, %cst_18 [1] : vector<16x32xf32> to vector<16xf32>
      %26 = vector.shape_cast %25 : vector<16xf32> to vector<16x1xf32>
      %cst_19 = arith.constant 3.200000e+01 : f32
      %27 = vector.broadcast %cst_19 : f32 to vector<16x1xf32>
      %28 = arith.divf %26, %27 : vector<16x1xf32>
      %29 = vector.broadcast %21 : vector<16x1xf32> to vector<16x32xf32>
      %30 = arith.subf %17, %29 : vector<16x32xf32>
      %cst_20 = arith.constant 9.99999974E-6 : f32
      %31 = vector.broadcast %cst_20 : f32 to vector<16x1xf32>
      %32 = arith.addf %28, %31 : vector<16x1xf32>
      %33 = math.rsqrt %32 : vector<16x1xf32>
      %34 = vector.broadcast %33 : vector<16x1xf32> to vector<16x32xf32>
      %35 = arith.mulf %30, %34 : vector<16x32xf32>
      %c0_21 = arith.constant 0 : index
      %c0_22 = arith.constant 0 : index
      %36 = vector.load %arg6[%c0_21, %c0_22] : memref<1x32xf32, #tpu.memory_space<vmem>>, vector<1x32xf32>
      %37 = vector.broadcast %36 : vector<1x32xf32> to vector<16x32xf32>
      %38 = arith.mulf %35, %37 : vector<16x32xf32>
      %c0_23 = arith.constant 0 : index
      %c0_24 = arith.constant 0 : index
      %39 = vector.load %arg7[%c0_23, %c0_24] : memref<1x32xf32, #tpu.memory_space<vmem>>, vector<1x32xf32>
      %40 = vector.broadcast %39 : vector<1x32xf32> to vector<16x32xf32>
      %41 = arith.addf %38, %40 : vector<16x32xf32>
      %c0_25 = arith.constant 0 : index
      %c0_26 = arith.constant 0 : index
      %42 = vector.load %arg8[%c0_25, %c0_26] : memref<16x32xf32, #tpu.memory_space<vmem>>, vector<16x32xf32>
      tpu.vector_store %arg8[%c0_25, %c0_26], %41 {strides = array<i32>} : memref<16x32xf32, #tpu.memory_space<vmem>>, vector<16x32xf32>,
    } else {
    }
    return
  }
  func.func @transform_0(%arg0: i32, %arg1: i32) -> (i32, i32) {
    %c0_i32 = arith.constant 0 : i32
    return %arg0, %arg1 : i32, i32
  }
  func.func @transform_1(%arg0: i32, %arg1: i32) -> (i32, i32) {
    %c0_i32 = arith.constant 0 : i32
    %c0_i32_0 = arith.constant 0 : i32
    return %arg1, %c0_i32 : i32, i32
  }
  func.func @transform_2(%arg0: i32, %arg1: i32) -> (i32, i32) {
    %c0_i32 = arith.constant 0 : i32
    %c0_i32_0 = arith.constant 0 : i32
    %c0_i32_1 = arith.constant 0 : i32
    return %c0_i32, %c0_i32_0 : i32, i32
  }
  func.func @transform_3(%arg0: i32, %arg1: i32) -> (i32, i32) {
    %c0_i32 = arith.constant 0 : i32
    %c0_i32_0 = arith.constant 0 : i32
    return %arg0, %c0_i32 : i32, i32
  }
  func.func @transform_4(%arg0: i32, %arg1: i32) -> (i32, i32) {
    %c0_i32 = arith.constant 0 : i32
    %c0_i32_0 = arith.constant 0 : i32
    %c0_i32_1 = arith.constant 0 : i32
    return %c0_i32, %c0_i32_0 : i32, i32
  }
  func.func @transform_5(%arg0: i32, %arg1: i32) -> (i32, i32) {
    %c0_i32 = arith.constant 0 : i32
    %c0_i32_0 = arith.constant 0 : i32
    %c0_i32_1 = arith.constant 0 : i32
    return %c0_i32, %c0_i32_0 : i32, i32
  }
  func.func @transform_6(%arg0: i32, %arg1: i32) -> (i32, i32) {
    %c0_i32 = arith.constant 0 : i32
    %c0_i32_0 = arith.constant 0 : i32
    return %arg0, %c0_i32 : i32, i32
  }
}

module attributes {stable_mosaic.version = 11 : i64} {
  func.func @_matmul_bias_kernel(%arg0: i32, %arg1: i32, %arg2: i32, %arg3: memref<16x32xf32, #tpu.memory_space<vmem>>, %arg4: memref<32x64xbf16, #tpu.memory_space<vmem>>, %arg5: memref<1x64xf32, #tpu.memory_space<vmem>>, %arg6: memref<16x64xbf16, #tpu.memory_space<vmem>>, %arg7: memref<16x64xf32, #tpu.memory_space<vmem>>) attributes {dimension_semantics = [#tpu.dimension_semantics<parallel>, #tpu.dimension_semantics<parallel>, #tpu.dimension_semantics<arbitrary>], iteration_bounds = array<i64: 1, 1, 1>, scalar_prefetch = 0 : i64, scratch_operands = 1 : i64, tpu.core_type = #tpu.core_type<tc>, window_params = [{transform_indices = @transform_0, window_bounds = array<i64: 16, 32>}, {transform_indices = @transform_1, window_bounds = array<i64: 32, 64>}, {transform_indices = @transform_2, window_bounds = array<i64: 1, 64>}, {transform_indices = @transform_3, window_bounds = array<i64: 16, 64>}]} {
    %c0_i32 = arith.constant 0 : i32
    %0 = arith.cmpi eq, %arg2, %c0_i32 : i32
    %1 = arith.extui %0 : i1 to i32
    %c0_i32_0 = arith.constant 0 : i32
    %2 = arith.cmpi ne, %1, %c0_i32_0 : i32
    scf.if %2 {
      %cst_10 = arith.constant 0.000000e+00 : f32
      %13 = vector.broadcast %cst_10 : f32 to vector<16x64xf32>
      %c0_11 = arith.constant 0 : index
      %c0_12 = arith.constant 0 : index
      %14 = vector.load %arg7[%c0_11, %c0_12] : memref<16x64xf32, #tpu.memory_space<vmem>>, vector<16x64xf32>
      tpu.vector_store %arg7[%c0_11, %c0_12], %13 {strides = array<i32>} : memref<16x64xf32, #tpu.memory_space<vmem>>, vector<16x64xf32>,
    } else {
    }
    %c0 = arith.constant 0 : index
    %c0_1 = arith.constant 0 : index
    %3 = vector.load %arg3[%c0, %c0_1] : memref<16x32xf32, #tpu.memory_space<vmem>>, vector<16x32xf32>
    %4 = arith.truncf %3 : vector<16x32xf32> to vector<16x32xbf16>
    %c0_2 = arith.constant 0 : index
    %c0_3 = arith.constant 0 : index
    %5 = vector.load %arg7[%c0_2, %c0_3] : memref<16x64xf32, #tpu.memory_space<vmem>>, vector<16x64xf32>
    %c0_4 = arith.constant 0 : index
    %c0_5 = arith.constant 0 : index
    %6 = vector.load %arg4[%c0_4, %c0_5] : memref<32x64xbf16, #tpu.memory_space<vmem>>, vector<32x64xbf16>
    %cst = arith.constant dense<0.000000e+00> : vector<16x64xf32>
    %7 = tpu.matmul %4, %6, %cst {dimension_numbers = #tpu.dot_dimension_numbers<[1], [0], [0], [1], [0, 0, 1, 1], [], []>} : vector<16x32xbf16>, vector<32x64xbf16>, vector<16x64xf32> -> vector<16x64xf32>
    %8 = arith.addf %5, %7 : vector<16x64xf32>
    %c0_6 = arith.constant 0 : index
    %c0_7 = arith.constant 0 : index
    %9 = vector.load %arg7[%c0_6, %c0_7] : memref<16x64xf32, #tpu.memory_space<vmem>>, vector<16x64xf32>
    tpu.vector_store %arg7[%c0_6, %c0_7], %8 {strides = array<i32>} : memref<16x64xf32, #tpu.memory_space<vmem>>, vector<16x64xf32>,
    %c0_i32_8 = arith.constant 0 : i32
    %10 = arith.cmpi eq, %arg2, %c0_i32_8 : i32
    %11 = arith.extui %10 : i1 to i32
    %c0_i32_9 = arith.constant 0 : i32
    %12 = arith.cmpi ne, %11, %c0_i32_9 : i32
    scf.if %12 {
      %c0_10 = arith.constant 0 : index
      %c0_11 = arith.constant 0 : index
      %13 = vector.load %arg7[%c0_10, %c0_11] : memref<16x64xf32, #tpu.memory_space<vmem>>, vector<16x64xf32>
      %c0_12 = arith.constant 0 : index
      %c0_13 = arith.constant 0 : index
      %14 = vector.load %arg5[%c0_12, %c0_13] : memref<1x64xf32, #tpu.memory_space<vmem>>, vector<1x64xf32>
      %15 = vector.broadcast %14 : vector<1x64xf32> to vector<16x64xf32>
      %16 = arith.addf %13, %15 : vector<16x64xf32>
      %cst_14 = arith.constant 0.000000e+00 : f32
      %17 = vector.broadcast %cst_14 : f32 to vector<16x64xf32>
      %18 = arith.maximumf %16, %17 : vector<16x64xf32>
      %19 = arith.truncf %18 : vector<16x64xf32> to vector<16x64xbf16>
      %c0_15 = arith.constant 0 : index
      %c0_16 = arith.constant 0 : index
      %20 = vector.load %arg6[%c0_15, %c0_16] : memref<16x64xbf16, #tpu.memory_space<vmem>>, vector<16x64xbf16>
      tpu.vector_store %arg6[%c0_15, %c0_16], %19 {strides = array<i32>} : memref<16x64xbf16, #tpu.memory_space<vmem>>, vector<16x64xbf16>,
    } else {
    }
    return
  }
  func.func @transform_0(%arg0: i32, %arg1: i32, %arg2: i32) -> (i32, i32) {
    %c0_i32 = arith.constant 0 : i32
    return %arg0, %arg2 : i32, i32
  }
  func.func @transform_1(%arg0: i32, %arg1: i32, %arg2: i32) -> (i32, i32) {
    %c0_i32 = arith.constant 0 : i32
    return %arg2, %arg1 : i32, i32
  }
  func.func @transform_2(%arg0: i32, %arg1: i32, %arg2: i32) -> (i32, i32) {
    %c0_i32 = arith.constant 0 : i32
    %c0_i32_0 = arith.constant 0 : i32
    return %c0_i32, %arg1 : i32, i32
  }
  func.func @transform_3(%arg0: i32, %arg1: i32, %arg2: i32) -> (i32, i32) {
    %c0_i32 = arith.constant 0 : i32
    return %arg0, %arg1 : i32, i32
  }
}

module attributes {stable_mosaic.version = 11 : i64} {
  func.func @_matmul_bias_kernel(%arg0: i32, %arg1: i32, %arg2: i32, %arg3: memref<16x32xf32, #tpu.memory_space<vmem>>, %arg4: memref<32x96xbf16, #tpu.memory_space<vmem>>, %arg5: memref<1x96xf32, #tpu.memory_space<vmem>>, %arg6: memref<16x96xbf16, #tpu.memory_space<vmem>>, %arg7: memref<16x96xf32, #tpu.memory_space<vmem>>) attributes {dimension_semantics = [#tpu.dimension_semantics<parallel>, #tpu.dimension_semantics<parallel>, #tpu.dimension_semantics<arbitrary>], iteration_bounds = array<i64: 1, 1, 1>, scalar_prefetch = 0 : i64, scratch_operands = 1 : i64, tpu.core_type = #tpu.core_type<tc>, window_params = [{transform_indices = @transform_0, window_bounds = array<i64: 16, 32>}, {transform_indices = @transform_1, window_bounds = array<i64: 32, 96>}, {transform_indices = @transform_2, window_bounds = array<i64: 1, 96>}, {transform_indices = @transform_3, window_bounds = array<i64: 16, 96>}]} {
    %c0_i32 = arith.constant 0 : i32
    %0 = arith.cmpi eq, %arg2, %c0_i32 : i32
    %1 = arith.extui %0 : i1 to i32
    %c0_i32_0 = arith.constant 0 : i32
    %2 = arith.cmpi ne, %1, %c0_i32_0 : i32
    scf.if %2 {
      %cst_10 = arith.constant 0.000000e+00 : f32
      %13 = vector.broadcast %cst_10 : f32 to vector<16x96xf32>
      %c0_11 = arith.constant 0 : index
      %c0_12 = arith.constant 0 : index
      %14 = vector.load %arg7[%c0_11, %c0_12] : memref<16x96xf32, #tpu.memory_space<vmem>>, vector<16x96xf32>
      tpu.vector_store %arg7[%c0_11, %c0_12], %13 {strides = array<i32>} : memref<16x96xf32, #tpu.memory_space<vmem>>, vector<16x96xf32>,
    } else {
    }
    %c0 = arith.constant 0 : index
    %c0_1 = arith.constant 0 : index
    %3 = vector.load %arg3[%c0, %c0_1] : memref<16x32xf32, #tpu.memory_space<vmem>>, vector<16x32xf32>
    %4 = arith.truncf %3 : vector<16x32xf32> to vector<16x32xbf16>
    %c0_2 = arith.constant 0 : index
    %c0_3 = arith.constant 0 : index
    %5 = vector.load %arg7[%c0_2, %c0_3] : memref<16x96xf32, #tpu.memory_space<vmem>>, vector<16x96xf32>
    %c0_4 = arith.constant 0 : index
    %c0_5 = arith.constant 0 : index
    %6 = vector.load %arg4[%c0_4, %c0_5] : memref<32x96xbf16, #tpu.memory_space<vmem>>, vector<32x96xbf16>
    %cst = arith.constant dense<0.000000e+00> : vector<16x96xf32>
    %7 = tpu.matmul %4, %6, %cst {dimension_numbers = #tpu.dot_dimension_numbers<[1], [0], [0], [1], [0, 0, 1, 1], [], []>} : vector<16x32xbf16>, vector<32x96xbf16>, vector<16x96xf32> -> vector<16x96xf32>
    %8 = arith.addf %5, %7 : vector<16x96xf32>
    %c0_6 = arith.constant 0 : index
    %c0_7 = arith.constant 0 : index
    %9 = vector.load %arg7[%c0_6, %c0_7] : memref<16x96xf32, #tpu.memory_space<vmem>>, vector<16x96xf32>
    tpu.vector_store %arg7[%c0_6, %c0_7], %8 {strides = array<i32>} : memref<16x96xf32, #tpu.memory_space<vmem>>, vector<16x96xf32>,
    %c0_i32_8 = arith.constant 0 : i32
    %10 = arith.cmpi eq, %arg2, %c0_i32_8 : i32
    %11 = arith.extui %10 : i1 to i32
    %c0_i32_9 = arith.constant 0 : i32
    %12 = arith.cmpi ne, %11, %c0_i32_9 : i32
    scf.if %12 {
      %c0_10 = arith.constant 0 : index
      %c0_11 = arith.constant 0 : index
      %13 = vector.load %arg7[%c0_10, %c0_11] : memref<16x96xf32, #tpu.memory_space<vmem>>, vector<16x96xf32>
      %c0_12 = arith.constant 0 : index
      %c0_13 = arith.constant 0 : index
      %14 = vector.load %arg5[%c0_12, %c0_13] : memref<1x96xf32, #tpu.memory_space<vmem>>, vector<1x96xf32>
      %15 = vector.broadcast %14 : vector<1x96xf32> to vector<16x96xf32>
      %16 = arith.addf %13, %15 : vector<16x96xf32>
      %17 = arith.truncf %16 : vector<16x96xf32> to vector<16x96xbf16>
      %c0_14 = arith.constant 0 : index
      %c0_15 = arith.constant 0 : index
      %18 = vector.load %arg6[%c0_14, %c0_15] : memref<16x96xbf16, #tpu.memory_space<vmem>>, vector<16x96xbf16>
      tpu.vector_store %arg6[%c0_14, %c0_15], %17 {strides = array<i32>} : memref<16x96xbf16, #tpu.memory_space<vmem>>, vector<16x96xbf16>,
    } else {
    }
    return
  }
  func.func @transform_0(%arg0: i32, %arg1: i32, %arg2: i32) -> (i32, i32) {
    %c0_i32 = arith.constant 0 : i32
    return %arg0, %arg2 : i32, i32
  }
  func.func @transform_1(%arg0: i32, %arg1: i32, %arg2: i32) -> (i32, i32) {
    %c0_i32 = arith.constant 0 : i32
    return %arg2, %arg1 : i32, i32
  }
  func.func @transform_2(%arg0: i32, %arg1: i32, %arg2: i32) -> (i32, i32) {
    %c0_i32 = arith.constant 0 : i32
    %c0_i32_0 = arith.constant 0 : i32
    return %c0_i32, %arg1 : i32, i32
  }
  func.func @transform_3(%arg0: i32, %arg1: i32, %arg2: i32) -> (i32, i32) {
    %c0_i32 = arith.constant 0 : i32
    return %arg0, %arg1 : i32, i32
  }
}

module attributes {stable_mosaic.version = 11 : i64} {
  func.func @_matmul_res_ln_kernel(%arg0: i32, %arg1: i32, %arg2: memref<16x64xbf16, #tpu.memory_space<vmem>>, %arg3: memref<64x32xbf16, #tpu.memory_space<vmem>>, %arg4: memref<1x32xf32, #tpu.memory_space<vmem>>, %arg5: memref<16x32xf32, #tpu.memory_space<vmem>>, %arg6: memref<1x32xf32, #tpu.memory_space<vmem>>, %arg7: memref<1x32xf32, #tpu.memory_space<vmem>>, %arg8: memref<16x32xf32, #tpu.memory_space<vmem>>, %arg9: memref<16x32xf32, #tpu.memory_space<vmem>>) attributes {dimension_semantics = [#tpu.dimension_semantics<parallel>, #tpu.dimension_semantics<arbitrary>], iteration_bounds = array<i64: 1, 1>, scalar_prefetch = 0 : i64, scratch_operands = 1 : i64, tpu.core_type = #tpu.core_type<tc>, window_params = [{transform_indices = @transform_0, window_bounds = array<i64: 16, 64>}, {transform_indices = @transform_1, window_bounds = array<i64: 64, 32>}, {pipeline_mode = #tpu.pipeline_mode<synchronous>, transform_indices = @transform_2, window_bounds = array<i64: 1, 32>}, {transform_indices = @transform_3, window_bounds = array<i64: 16, 32>}, {pipeline_mode = #tpu.pipeline_mode<synchronous>, transform_indices = @transform_4, window_bounds = array<i64: 1, 32>}, {pipeline_mode = #tpu.pipeline_mode<synchronous>, transform_indices = @transform_5, window_bounds = array<i64: 1, 32>}, {transform_indices = @transform_6, window_bounds = array<i64: 16, 32>}]} {
    %c0_i32 = arith.constant 0 : i32
    %0 = arith.cmpi eq, %arg1, %c0_i32 : i32
    %1 = arith.extui %0 : i1 to i32
    %c0_i32_0 = arith.constant 0 : i32
    %2 = arith.cmpi ne, %1, %c0_i32_0 : i32
    scf.if %2 {
      %cst_10 = arith.constant 0.000000e+00 : f32
      %12 = vector.broadcast %cst_10 : f32 to vector<16x32xf32>
      %c0_11 = arith.constant 0 : index
      %c0_12 = arith.constant 0 : index
      %13 = vector.load %arg9[%c0_11, %c0_12] : memref<16x32xf32, #tpu.memory_space<vmem>>, vector<16x32xf32>
      tpu.vector_store %arg9[%c0_11, %c0_12], %12 {strides = array<i32>} : memref<16x32xf32, #tpu.memory_space<vmem>>, vector<16x32xf32>,
    } else {
    }
    %c0 = arith.constant 0 : index
    %c0_1 = arith.constant 0 : index
    %3 = vector.load %arg2[%c0, %c0_1] : memref<16x64xbf16, #tpu.memory_space<vmem>>, vector<16x64xbf16>
    %c0_2 = arith.constant 0 : index
    %c0_3 = arith.constant 0 : index
    %4 = vector.load %arg9[%c0_2, %c0_3] : memref<16x32xf32, #tpu.memory_space<vmem>>, vector<16x32xf32>
    %c0_4 = arith.constant 0 : index
    %c0_5 = arith.constant 0 : index
    %5 = vector.load %arg3[%c0_4, %c0_5] : memref<64x32xbf16, #tpu.memory_space<vmem>>, vector<64x32xbf16>
    %cst = arith.constant dense<0.000000e+00> : vector<16x32xf32>
    %6 = tpu.matmul %3, %5, %cst {dimension_numbers = #tpu.dot_dimension_numbers<[1], [0], [0], [1], [0, 0, 1, 1], [], []>} : vector<16x64xbf16>, vector<64x32xbf16>, vector<16x32xf32> -> vector<16x32xf32>
    %7 = arith.addf %4, %6 : vector<16x32xf32>
    %c0_6 = arith.constant 0 : index
    %c0_7 = arith.constant 0 : index
    %8 = vector.load %arg9[%c0_6, %c0_7] : memref<16x32xf32, #tpu.memory_space<vmem>>, vector<16x32xf32>
    tpu.vector_store %arg9[%c0_6, %c0_7], %7 {strides = array<i32>} : memref<16x32xf32, #tpu.memory_space<vmem>>, vector<16x32xf32>,
    %c0_i32_8 = arith.constant 0 : i32
    %9 = arith.cmpi eq, %arg1, %c0_i32_8 : i32
    %10 = arith.extui %9 : i1 to i32
    %c0_i32_9 = arith.constant 0 : i32
    %11 = arith.cmpi ne, %10, %c0_i32_9 : i32
    scf.if %11 {
      %c0_10 = arith.constant 0 : index
      %c0_11 = arith.constant 0 : index
      %12 = vector.load %arg9[%c0_10, %c0_11] : memref<16x32xf32, #tpu.memory_space<vmem>>, vector<16x32xf32>
      %c0_12 = arith.constant 0 : index
      %c0_13 = arith.constant 0 : index
      %13 = vector.load %arg4[%c0_12, %c0_13] : memref<1x32xf32, #tpu.memory_space<vmem>>, vector<1x32xf32>
      %14 = vector.broadcast %13 : vector<1x32xf32> to vector<16x32xf32>
      %15 = arith.addf %12, %14 : vector<16x32xf32>
      %c0_14 = arith.constant 0 : index
      %c0_15 = arith.constant 0 : index
      %16 = vector.load %arg5[%c0_14, %c0_15] : memref<16x32xf32, #tpu.memory_space<vmem>>, vector<16x32xf32>
      %17 = arith.addf %15, %16 : vector<16x32xf32>
      %cst_16 = arith.constant dense<0.000000e+00> : vector<16xf32>
      %18 = vector.multi_reduction <add>, %17, %cst_16 [1] : vector<16x32xf32> to vector<16xf32>
      %19 = vector.shape_cast %18 : vector<16xf32> to vector<16x1xf32>
      %cst_17 = arith.constant 3.200000e+01 : f32
      %20 = vector.broadcast %cst_17 : f32 to vector<16x1xf32>
      %21 = arith.divf %19, %20 : vector<16x1xf32>
      %22 = vector.broadcast %21 : vector<16x1xf32> to vector<16x32xf32>
      %23 = arith.subf %17, %22 : vector<16x32xf32>
      %24 = arith.mulf %23, %23 : vector<16x32xf32>
      %cst_18 = arith.constant dense<0.000000e+00> : vector<16xf32>
      %25 = vector.multi_reduction <add>, %24, %cst_18 [1] : vector<16x32xf32> to vector<16xf32>
      %26 = vector.shape_cast %25 : vector<16xf32> to vector<16x1xf32>
      %cst_19 = arith.constant 3.200000e+01 : f32
      %27 = vector.broadcast %cst_19 : f32 to vector<16x1xf32>
      %28 = arith.divf %26, %27 : vector<16x1xf32>
      %29 = vector.broadcast %21 : vector<16x1xf32> to vector<16x32xf32>
      %30 = arith.subf %17, %29 : vector<16x32xf32>
      %cst_20 = arith.constant 9.99999974E-6 : f32
      %31 = vector.broadcast %cst_20 : f32 to vector<16x1xf32>
      %32 = arith.addf %28, %31 : vector<16x1xf32>
      %33 = math.rsqrt %32 : vector<16x1xf32>
      %34 = vector.broadcast %33 : vector<16x1xf32> to vector<16x32xf32>
      %35 = arith.mulf %30, %34 : vector<16x32xf32>
      %c0_21 = arith.constant 0 : index
      %c0_22 = arith.constant 0 : index
      %36 = vector.load %arg6[%c0_21, %c0_22] : memref<1x32xf32, #tpu.memory_space<vmem>>, vector<1x32xf32>
      %37 = vector.broadcast %36 : vector<1x32xf32> to vector<16x32xf32>
      %38 = arith.mulf %35, %37 : vector<16x32xf32>
      %c0_23 = arith.constant 0 : index
      %c0_24 = arith.constant 0 : index
      %39 = vector.load %arg7[%c0_23, %c0_24] : memref<1x32xf32, #tpu.memory_space<vmem>>, vector<1x32xf32>
      %40 = vector.broadcast %39 : vector<1x32xf32> to vector<16x32xf32>
      %41 = arith.addf %38, %40 : vector<16x32xf32>
      %c0_25 = arith.constant 0 : index
      %c0_26 = arith.constant 0 : index
      %42 = vector.load %arg8[%c0_25, %c0_26] : memref<16x32xf32, #tpu.memory_space<vmem>>, vector<16x32xf32>
      tpu.vector_store %arg8[%c0_25, %c0_26], %41 {strides = array<i32>} : memref<16x32xf32, #tpu.memory_space<vmem>>, vector<16x32xf32>,
    } else {
    }
    return
  }
  func.func @transform_0(%arg0: i32, %arg1: i32) -> (i32, i32) {
    %c0_i32 = arith.constant 0 : i32
    return %arg0, %arg1 : i32, i32
  }
  func.func @transform_1(%arg0: i32, %arg1: i32) -> (i32, i32) {
    %c0_i32 = arith.constant 0 : i32
    %c0_i32_0 = arith.constant 0 : i32
    return %arg1, %c0_i32 : i32, i32
  }
  func.func @transform_2(%arg0: i32, %arg1: i32) -> (i32, i32) {
    %c0_i32 = arith.constant 0 : i32
    %c0_i32_0 = arith.constant 0 : i32
    %c0_i32_1 = arith.constant 0 : i32
    return %c0_i32, %c0_i32_0 : i32, i32
  }
  func.func @transform_3(%arg0: i32, %arg1: i32) -> (i32, i32) {
    %c0_i32 = arith.constant 0 : i32
    %c0_i32_0 = arith.constant 0 : i32
    return %arg0, %c0_i32 : i32, i32
  }
  func.func @transform_4(%arg0: i32, %arg1: i32) -> (i32, i32) {
    %c0_i32 = arith.constant 0 : i32
    %c0_i32_0 = arith.constant 0 : i32
    %c0_i32_1 = arith.constant 0 : i32
    return %c0_i32, %c0_i32_0 : i32, i32
  }
  func.func @transform_5(%arg0: i32, %arg1: i32) -> (i32, i32) {
    %c0_i32 = arith.constant 0 : i32
    %c0_i32_0 = arith.constant 0 : i32
    %c0_i32_1 = arith.constant 0 : i32
    return %c0_i32, %c0_i32_0 : i32, i32
  }
  func.func @transform_6(%arg0: i32, %arg1: i32) -> (i32, i32) {
    %c0_i32 = arith.constant 0 : i32
    %c0_i32_0 = arith.constant 0 : i32
    return %arg0, %c0_i32 : i32, i32
  }
}

module attributes {stable_mosaic.version = 11 : i64} {
  func.func @_matmul_res_ln_kernel(%arg0: i32, %arg1: i32, %arg2: memref<16x64xbf16, #tpu.memory_space<vmem>>, %arg3: memref<64x32xbf16, #tpu.memory_space<vmem>>, %arg4: memref<1x32xf32, #tpu.memory_space<vmem>>, %arg5: memref<16x32xf32, #tpu.memory_space<vmem>>, %arg6: memref<1x32xf32, #tpu.memory_space<vmem>>, %arg7: memref<1x32xf32, #tpu.memory_space<vmem>>, %arg8: memref<16x32xf32, #tpu.memory_space<vmem>>, %arg9: memref<16x32xf32, #tpu.memory_space<vmem>>) attributes {dimension_semantics = [#tpu.dimension_semantics<parallel>, #tpu.dimension_semantics<arbitrary>], iteration_bounds = array<i64: 1, 1>, scalar_prefetch = 0 : i64, scratch_operands = 1 : i64, tpu.core_type = #tpu.core_type<tc>, window_params = [{transform_indices = @transform_0, window_bounds = array<i64: 16, 64>}, {transform_indices = @transform_1, window_bounds = array<i64: 64, 32>}, {pipeline_mode = #tpu.pipeline_mode<synchronous>, transform_indices = @transform_2, window_bounds = array<i64: 1, 32>}, {transform_indices = @transform_3, window_bounds = array<i64: 16, 32>}, {pipeline_mode = #tpu.pipeline_mode<synchronous>, transform_indices = @transform_4, window_bounds = array<i64: 1, 32>}, {pipeline_mode = #tpu.pipeline_mode<synchronous>, transform_indices = @transform_5, window_bounds = array<i64: 1, 32>}, {transform_indices = @transform_6, window_bounds = array<i64: 16, 32>}]} {
    %c0_i32 = arith.constant 0 : i32
    %0 = arith.cmpi eq, %arg1, %c0_i32 : i32
    %1 = arith.extui %0 : i1 to i32
    %c0_i32_0 = arith.constant 0 : i32
    %2 = arith.cmpi ne, %1, %c0_i32_0 : i32
    scf.if %2 {
      %cst_10 = arith.constant 0.000000e+00 : f32
      %12 = vector.broadcast %cst_10 : f32 to vector<16x32xf32>
      %c0_11 = arith.constant 0 : index
      %c0_12 = arith.constant 0 : index
      %13 = vector.load %arg9[%c0_11, %c0_12] : memref<16x32xf32, #tpu.memory_space<vmem>>, vector<16x32xf32>
      tpu.vector_store %arg9[%c0_11, %c0_12], %12 {strides = array<i32>} : memref<16x32xf32, #tpu.memory_space<vmem>>, vector<16x32xf32>,
    } else {
    }
    %c0 = arith.constant 0 : index
    %c0_1 = arith.constant 0 : index
    %3 = vector.load %arg2[%c0, %c0_1] : memref<16x64xbf16, #tpu.memory_space<vmem>>, vector<16x64xbf16>
    %c0_2 = arith.constant 0 : index
    %c0_3 = arith.constant 0 : index
    %4 = vector.load %arg9[%c0_2, %c0_3] : memref<16x32xf32, #tpu.memory_space<vmem>>, vector<16x32xf32>
    %c0_4 = arith.constant 0 : index
    %c0_5 = arith.constant 0 : index
    %5 = vector.load %arg3[%c0_4, %c0_5] : memref<64x32xbf16, #tpu.memory_space<vmem>>, vector<64x32xbf16>
    %cst = arith.constant dense<0.000000e+00> : vector<16x32xf32>
    %6 = tpu.matmul %3, %5, %cst {dimension_numbers = #tpu.dot_dimension_numbers<[1], [0], [0], [1], [0, 0, 1, 1], [], []>} : vector<16x64xbf16>, vector<64x32xbf16>, vector<16x32xf32> -> vector<16x32xf32>
    %7 = arith.addf %4, %6 : vector<16x32xf32>
    %c0_6 = arith.constant 0 : index
    %c0_7 = arith.constant 0 : index
    %8 = vector.load %arg9[%c0_6, %c0_7] : memref<16x32xf32, #tpu.memory_space<vmem>>, vector<16x32xf32>
    tpu.vector_store %arg9[%c0_6, %c0_7], %7 {strides = array<i32>} : memref<16x32xf32, #tpu.memory_space<vmem>>, vector<16x32xf32>,
    %c0_i32_8 = arith.constant 0 : i32
    %9 = arith.cmpi eq, %arg1, %c0_i32_8 : i32
    %10 = arith.extui %9 : i1 to i32
    %c0_i32_9 = arith.constant 0 : i32
    %11 = arith.cmpi ne, %10, %c0_i32_9 : i32
    scf.if %11 {
      %c0_10 = arith.constant 0 : index
      %c0_11 = arith.constant 0 : index
      %12 = vector.load %arg9[%c0_10, %c0_11] : memref<16x32xf32, #tpu.memory_space<vmem>>, vector<16x32xf32>
      %c0_12 = arith.constant 0 : index
      %c0_13 = arith.constant 0 : index
      %13 = vector.load %arg4[%c0_12, %c0_13] : memref<1x32xf32, #tpu.memory_space<vmem>>, vector<1x32xf32>
      %14 = vector.broadcast %13 : vector<1x32xf32> to vector<16x32xf32>
      %15 = arith.addf %12, %14 : vector<16x32xf32>
      %c0_14 = arith.constant 0 : index
      %c0_15 = arith.constant 0 : index
      %16 = vector.load %arg5[%c0_14, %c0_15] : memref<16x32xf32, #tpu.memory_space<vmem>>, vector<16x32xf32>
      %17 = arith.addf %15, %16 : vector<16x32xf32>
      %cst_16 = arith.constant dense<0.000000e+00> : vector<16xf32>
      %18 = vector.multi_reduction <add>, %17, %cst_16 [1] : vector<16x32xf32> to vector<16xf32>
      %19 = vector.shape_cast %18 : vector<16xf32> to vector<16x1xf32>
      %cst_17 = arith.constant 3.200000e+01 : f32
      %20 = vector.broadcast %cst_17 : f32 to vector<16x1xf32>
      %21 = arith.divf %19, %20 : vector<16x1xf32>
      %22 = vector.broadcast %21 : vector<16x1xf32> to vector<16x32xf32>
      %23 = arith.subf %17, %22 : vector<16x32xf32>
      %24 = arith.mulf %23, %23 : vector<16x32xf32>
      %cst_18 = arith.constant dense<0.000000e+00> : vector<16xf32>
      %25 = vector.multi_reduction <add>, %24, %cst_18 [1] : vector<16x32xf32> to vector<16xf32>
      %26 = vector.shape_cast %25 : vector<16xf32> to vector<16x1xf32>
      %cst_19 = arith.constant 3.200000e+01 : f32
      %27 = vector.broadcast %cst_19 : f32 to vector<16x1xf32>
      %28 = arith.divf %26, %27 : vector<16x1xf32>
      %29 = vector.broadcast %21 : vector<16x1xf32> to vector<16x32xf32>
      %30 = arith.subf %17, %29 : vector<16x32xf32>
      %cst_20 = arith.constant 9.99999974E-6 : f32
      %31 = vector.broadcast %cst_20 : f32 to vector<16x1xf32>
      %32 = arith.addf %28, %31 : vector<16x1xf32>
      %33 = math.rsqrt %32 : vector<16x1xf32>
      %34 = vector.broadcast %33 : vector<16x1xf32> to vector<16x32xf32>
      %35 = arith.mulf %30, %34 : vector<16x32xf32>
      %c0_21 = arith.constant 0 : index
      %c0_22 = arith.constant 0 : index
      %36 = vector.load %arg6[%c0_21, %c0_22] : memref<1x32xf32, #tpu.memory_space<vmem>>, vector<1x32xf32>
      %37 = vector.broadcast %36 : vector<1x32xf32> to vector<16x32xf32>
      %38 = arith.mulf %35, %37 : vector<16x32xf32>
      %c0_23 = arith.constant 0 : index
      %c0_24 = arith.constant 0 : index
      %39 = vector.load %arg7[%c0_23, %c0_24] : memref<1x32xf32, #tpu.memory_space<vmem>>, vector<1x32xf32>
      %40 = vector.broadcast %39 : vector<1x32xf32> to vector<16x32xf32>
      %41 = arith.addf %38, %40 : vector<16x32xf32>
      %c0_25 = arith.constant 0 : index
      %c0_26 = arith.constant 0 : index
      %42 = vector.load %arg8[%c0_25, %c0_26] : memref<16x32xf32, #tpu.memory_space<vmem>>, vector<16x32xf32>
      tpu.vector_store %arg8[%c0_25, %c0_26], %41 {strides = array<i32>} : memref<16x32xf32, #tpu.memory_space<vmem>>, vector<16x32xf32>,
    } else {
    }
    return
  }
  func.func @transform_0(%arg0: i32, %arg1: i32) -> (i32, i32) {
    %c0_i32 = arith.constant 0 : i32
    return %arg0, %arg1 : i32, i32
  }
  func.func @transform_1(%arg0: i32, %arg1: i32) -> (i32, i32) {
    %c0_i32 = arith.constant 0 : i32
    %c0_i32_0 = arith.constant 0 : i32
    return %arg1, %c0_i32 : i32, i32
  }
  func.func @transform_2(%arg0: i32, %arg1: i32) -> (i32, i32) {
    %c0_i32 = arith.constant 0 : i32
    %c0_i32_0 = arith.constant 0 : i32
    %c0_i32_1 = arith.constant 0 : i32
    return %c0_i32, %c0_i32_0 : i32, i32
  }
  func.func @transform_3(%arg0: i32, %arg1: i32) -> (i32, i32) {
    %c0_i32 = arith.constant 0 : i32
    %c0_i32_0 = arith.constant 0 : i32
    return %arg0, %c0_i32 : i32, i32
  }
  func.func @transform_4(%arg0: i32, %arg1: i32) -> (i32, i32) {
    %c0_i32 = arith.constant 0 : i32
    %c0_i32_0 = arith.constant 0 : i32
    %c0_i32_1 = arith.constant 0 : i32
    return %c0_i32, %c0_i32_0 : i32, i32
  }
  func.func @transform_5(%arg0: i32, %arg1: i32) -> (i32, i32) {
    %c0_i32 = arith.constant 0 : i32
    %c0_i32_0 = arith.constant 0 : i32
    %c0_i32_1 = arith.constant 0 : i32
    return %c0_i32, %c0_i32_0 : i32, i32
  }
  func.func @transform_6(%arg0: i32, %arg1: i32) -> (i32, i32) {
    %c0_i32 = arith.constant 0 : i32
    %c0_i32_0 = arith.constant 0 : i32
    return %arg0, %c0_i32 : i32, i32
  }
}

</mosaic_0001>

<bundles_post_ra>
// kernel: bert_forward.13
= control target key start
LH: loop header
LB: loop body
LE: loop exit
PB: predicated region body
PF: predicated region fallthrough
CT: control target
= control target key end

     0   :  { %vm19_vm0 = vcmask 523264   ;;  %v101_v1 = vmov 0.0   ;;  %vm43_vm1 = vcmask 261120   ;;  %vm81_vm2 = vcmask 519168   ;;  %s147_s1 = inlined_call_operand.vmem [shape: bf16[32,64], index: 1, kind: input, shape index: {}]   ;;  %s148_s0 = inlined_call_operand.vmem [shape: f32[16,32], index: 0, kind: input, shape index: {}]   ;;  %s149_s2 = inlined_call_operand.vmem [shape: f32[1,64], index: 2, kind: input, shape index: {}]   ;;  %s150_s3 = inlined_call_operand.vmem [shape: bf16[16,64], index: 3, kind: output, shape index: {}]  }
   0x1   :  { %v98_v0 = vld [vmem:[%s147_s1 + $0x8] sm:$0xff]  ;;  %20 = vst.msk [vmem:[#allocation2] sm:$0xff] %vm19_vm0, %v101_v1  ;;  %v97_v2 = vld [vmem:[%s147_s1] sm:$0xff] }
   0x2   :  { %21 = vst.msk [vmem:[#allocation2 + $0x8] sm:$0xff] %vm19_vm0, %v101_v1  ;;  %53 = vmatpush.bf16.msra.mxu0 %v98_v0  ;;  %v22_v3 = vld [vmem:[%s148_s0] sm:$0xff]  ;;  %v23_v4 = vld [vmem:[%s148_s0 + $0x8] sm:$0xff] }
   0x3   :  { %v24_v5 = vpack.c.bf16 %v23_v4, %v22_v3  ;;  %v100_v10 = vld [vmem:[%s149_s2] ss:$0 sm:$0xff] }
   0x6   :  { %54 = vmatpush.bf16.msra.mxu0 %v97_v2 }
   0x8   :  { %v25_v6 = vld [vmem:[#allocation2] sm:$0xff] }
   0x9   :  { %96 = vmatmul.msk.bf16.vlgmr.msra.gmra.mxu0 %vm43_vm1, %v24_v5  ;;  %v26_v9 = vld [vmem:[#allocation2 + $0x8] sm:$0xff] }
  0x86   :  { %v56_v7 = vpop.f32.mrf.mxu0 }
  0x87   :  { %v61_v8 = vadd.f32 %v56_v7, %v25_v6 }
  0x89   :  { %64 = vst.msk [vmem:[#allocation2] sm:$0xff] %vm19_vm0, %v61_v8 }
  0x8e   :  { %v58_v11 = vpop.f32.mrf.mxu0 }
  0x8f   :  { %v62_v12 = vadd.f32 %v58_v11, %v26_v9 }
  0x90   :  { %v69_v13 = vld [vmem:[#allocation2] sm:$0xff] }
  0x91   :  { %v75_v14 = vadd.f32 %v100_v10, %v69_v13  ;;  %65 = vst.msk [vmem:[#allocation2 + $0x8] sm:$0xff] %vm19_vm0, %v62_v12 }
  0x93   :  { %v77_v15 = vmax.f32 %v75_v14, 0.0 }
  0x95   :  { %v79_v16 = vpack.c.bf16 %v77_v15, %v77_v15 }
  0x97   :  { %82 = vst.msk [vmem:[%s150_s3] sm:$0xf] %vm81_vm2, %v79_v16 }
  0x98   :  { %v70_v17 = vld [vmem:[#allocation2 + $0x8] sm:$0xff] }
  0x99   :  { %v76_v18 = vadd.f32 %v100_v10, %v70_v17 }
  0x9b   :  { %v78_v19 = vmax.f32 %v76_v18, 0.0 }
  0x9d   :  { %v80_v20 = vpack.c.bf16 %v78_v19, %v78_v19 }
  0x9f   :  { %83 = vst.msk [vmem:[%s150_s3 + $0x4] sm:$0xf] %vm81_vm2, %v80_v20 }

// kernel: bert_forward.11
= control target key start
LH: loop header
LB: loop body
LE: loop exit
PB: predicated region body
PF: predicated region fallthrough
CT: control target
= control target key end

     0   :  { %s699_s15 = smov 0   ;;  %s701_s16 = smov 0   ;;  %s770_s0 = inlined_call_operand.vmem [shape: bf16[2,4,8,8], index: 0, kind: input, shape index: {}]   ;;  %s771_s1 = inlined_call_operand.vmem [shape: bf16[2,4,8,8], index: 1, kind: input, shape index: {}]   ;;  %s772_s2 = inlined_call_operand.vmem [shape: bf16[2,4,8,8], index: 2, kind: input, shape index: {}]   ;;  %s773_s3 = inlined_call_operand.vmem [shape: bf16[2,8,8], index: 3, kind: input, shape index: {}]   ;;  %s774_s4 = inlined_call_operand.vmem [shape: bf16[2,4,8,8], index: 4, kind: output, shape index: {}]  }
   0x1   :  { %s703_s17 = smov 0   ;;  %s705_s18 = smov 0  }
   0x2   :  { %s707_s19 = smov 0  }
   0x3 LB: > { %s29_s20 = sadd.s32 1, %s664_s17  ;;  %s33_s21 = sadd.s32 1, %s668_s18  ;;  %s672_s19 = sphi %s707_s19, %s14_s19   ;;  %s668_s18 = sphi %s705_s18, %s778_s18   ;;  %s664_s17 = sphi %s703_s17, %s777_s17   ;;  %s660_s16 = sphi %s701_s16, %s776_s16   ;;  %s656_s15 = sphi %s699_s15, %s775_s15  }
   0x4   : > { %p31_p0 = scmp.ge.s32.totalorder %s29_s20, 4  ;;  %p576_p1 = scmp.ge.s32.totalorder %s672_s19, 1 }
   0x5   : > { %p239_p2 = scmp.lt.s32.totalorder %s672_s19, 9 }
   0x6   : > { %s780_s20 = smov (%p31_p0, %s29_s20), 0  ;;  %s782_s21 = smov (!%p31_p0, %s33_s21), %s668_s18 }
   0x7   : > { %p240_p3 = pnand %p576_p1, %p239_p2  ;;  %p35_p4 = scmp.ge.s32.totalorder %s782_s21, 2 }
   0x8   : > { %p300_p5 = scmp.lt.s32.totalorder (!%p240_p3), %s660_s16, 1  ;;  %p302_p6 = scmp.lt.s32.totalorder (!%p240_p3), %s656_s15, 3 }
   0x9   : > { %s784_s21 = smov (%p35_p4, %s782_s21), 0  ;;  %243 = sbr.rel (%p240_p3) target bundleno = 556 (0x22c), region = 36 }
   0xe   : > { %s786_s16 = smov (!%p300_p5, %s660_s16), 1  ;;  %s788_s15 = smov (!%p302_p6, %s656_s15), 3  ;;  %vm351_vm0 = vcmask 64512   ;;  %vm399_vm1 = vcmask 1043456   ;;  %vm417_vm6 = vcmask 60416  }
   0xf   : > { %s577_s22 = sshll.u32 %s786_s16, 2 }
  0x10   : > { %s308_s23 = sadd.s32 %s577_s22, %s788_s15  ;;  %s333_s7 = scalar_lea.vmem %s773_s3, %s577_s22 }
  0x11   : > { %s729_s24 = sshll.u32 %s308_s23, 2  ;;  %v349_v3 = vld [vmem:[%s333_s7] sm:$0xf] }
  0x12   : > { %s318_s27 = scalar_lea.vmem %s771_s1, %s729_s24  ;;  %s310_s30 = scalar_lea.vmem %s770_s0, %s729_s24  ;;  %v350_v4 = vunpack.c.l.bf16 %v349_v3 }
  0x13   : > { %v347_v0 = vld [vmem:[%s318_s27] sm:$0xf]  ;;  %s326_s10 = scalar_lea.vmem %s772_s2, %s729_s24  ;;  %s344_s13 = scalar_lea.vmem %s774_s4, %s729_s24 }
  0x14   : > { %v356_v1 = vsel %vm351_vm0, %v347_v0, 0  ;;  %v346_v2 = vld [vmem:[%s310_s30] sm:$0xf] }
  0x15   : > { %365 = vmatpush.bf16.xpose.msra.mxu0 %v356_v1  ;;  %v348_v14 = vld [vmem:[%s326_s10] sm:$0xf] }
  0x16   : > { %v401_v15 = vsel %vm399_vm1, %v348_v14, 0 }
  0x17   : > { %410 = vmatpush.bf16.msra.mxu1 %v401_v15 }
  0x1c   : > { %586 = vmatmul.msk.bf16.vlgmr.msra.gmra.mxu0 %vm351_vm0, %v346_v2 }
  0x99   : > { %v367_v5 = vpop.f32.mrf.mxu0 }
  0x9a   : > { %v368_v6 = vadd.f32 %v367_v5, %v350_v4 }
  0x9c   : > { %v371_v7 = vsel %vm351_vm0, %v368_v6, -inf }
  0x9d   : > { %372 = vmax.xlane.f32.xlu0 %v371_v7 }
  0xa1   : > { %v369_v8 = vpop.f32.mrf.mxu0 }
 0x110   : > { %v373_v9 = vpop.xlane.xlu0 %372 }
 0x111   : > { %v374_v10 = vsub.f32 %v368_v6, %v373_v9 }
 0x113   : > { %v375_v11 = vmul.f32 1.442695, %v374_v10 }
 0x115   : > { %630 = vpow2.f32 %v375_v11 }
 0x11b   : > { %v631_v12 = vpop.eup %630 }
 0x11c   : > { %v377_v13 = vsel %vm351_vm0, %v631_v12, 0.0 }
 0x11d   : > { %378 = vadd.xlane.f32.xlu0 %v377_v13 }
 0x190   : > { %v379_v16 = vpop.xlane.xlu0 %378 }
 0x191   : > { %632 = vrcp.f32 %v379_v16  ;;  %v391_v20 = vand.u32 2147483648, %v379_v16  ;;  %v389_v22 = vand.u32 2147483647, %v379_v16  ;;  %vm385_vm3 = vweird.f32 %v379_v16 }
 0x193   : > { %v392_v24 = vor.u32 1.1754944e-38, %v391_v20  ;;  %vm390_vm5 = vcmp.eq.f32.partialorder %v389_v22, 8.507059e+37 }
 0x197   : > { %v633_v17 = vpop.eup %632 }
 0x198   : > { %v381_v18 = vmul.f32 %v633_v17, %v379_v16  ;;  %vm386_vm2 = vweird.f32 %v633_v17 }
 0x199   : > { %vm387_vm4 = vmor %vm385_vm3, %vm386_vm2 }
 0x19a   : > { %v382_v19 = vsub.f32 1.0, %v381_v18 }
 0x19c   : > { %v383_v21 = vmul.f32 %v633_v17, %v382_v19 }
 0x19e   : > { %v384_v23 = vadd.f32 %v633_v17, %v383_v21 }
 0x1a0   : > { %v388_v25 = vsel %vm387_vm4, %v633_v17, %v384_v23 }
 0x1a1   : > { %v393_v26 = vsel %vm390_vm5, %v392_v24, %v388_v25 }
 0x1a2   : > { %v394_v27 = vmul.f32 %v631_v12, %v393_v26 }
 0x1a4   : > { %v395_v28 = vpack.c.bf16 %v394_v27, %v394_v27 }
 0x1a6   : > { %587 = vmatmul.msk.bf16.vlgmr.msra.gmra.mxu1 %vm351_vm0, %v395_v28 }
 0x223   : > { %v412_v29 = vpop.f32.mrf.mxu1 }
 0x224   : > { %v416_v30 = vpack.c.bf16 %v412_v29, %v412_v29 }
 0x226   : > { %418 = vst.msk [vmem:[%s344_s13] sm:$0xf] %vm417_vm6, %v416_v30 }
 0x22b   : > { %v414_v31 = vpop.f32.mrf.mxu1 }
 0x22c PF: > { %s14_s19 = sadd.s32 1, %s672_s19   ;;  %s775_s15 = smov %s664_s17 }
 0x22d   : > { %p11_p7 = scmp.ge.s32.totalorder %s14_s19, 10   ;;  %s776_s16 = smov %s668_s18 }
 0x22e   : > { %s777_s17 = smov %s780_s20  ;;  %s778_s18 = smov %s784_s21 }
 0x22f   :  { %13 = sbr.rel (!%p11_p7) target bundleno = 3 (0x3), region = 75 }

// kernel: bert_forward.12
= control target key start
LH: loop header
LB: loop body
LE: loop exit
PB: predicated region body
PF: predicated region fallthrough
CT: control target
= control target key end

     0   :  { %vm28_vm0 = vcmask 261120   ;;  %v189_v1 = vmov 0.0   ;;  %v190_v21 = vmov 32.0   ;;  %s267_s1 = inlined_call_operand.vmem [shape: bf16[32,32], index: 1, kind: input, shape index: {}]   ;;  %s268_s0 = inlined_call_operand.vmem [shape: bf16[16,32], index: 0, kind: input, shape index: {}]   ;;  %s269_s2 = inlined_call_operand.vmem [shape: f32[1,32], index: 2, kind: input, shape index: {}]   ;;  %s270_s3 = inlined_call_operand.vmem [shape: f32[16,32], index: 3, kind: input, shape index: {}]   ;;  %s271_s4 = inlined_call_operand.vmem [shape: f32[1,32], index: 4, kind: input, shape index: {}]   ;;  %s272_s5 = inlined_call_operand.vmem [shape: f32[1,32], index: 5, kind: input, shape index: {}]   ;;  %s273_s6 = inlined_call_operand.vmem [shape: f32[16,32], index: 6, kind: output, shape index: {}]  }
   0x1   :  { %v177_v0 = vld [vmem:[%s267_s1 + $0x8] sm:$0xff]  ;;  %29 = vst.msk [vmem:[#allocation2] sm:$0xff] %vm28_vm0, %v189_v1  ;;  %v176_v2 = vld [vmem:[%s267_s1] sm:$0xff]  ;;  %183 = vrcp.f32 %v190_v21 }
   0x2   :  { %30 = vst.msk [vmem:[#allocation2 + $0x8] sm:$0xff] %vm28_vm0, %v189_v1  ;;  %66 = vmatpush.bf16.msra.mxu0 %v177_v0  ;;  %v175_v3 = vld [vmem:[%s268_s0] sm:$0xff]  ;;  %v90_v17 = vld [vmem:[%s270_s3 + $0x8] sm:$0xff] }
   0x3   :  { %v180_v8 = vld [vmem:[%s269_s2] ss:$0 sm:$0xff] }
   0x4   :  { %v89_v12 = vld [vmem:[%s270_s3] sm:$0xff] }
   0x5   :  { %v181_v52 = vld [vmem:[%s271_s4] ss:$0 sm:$0xff] }
   0x6   :  { %67 = vmatpush.bf16.msra.mxu0 %v176_v2  ;;  %v182_v55 = vld [vmem:[%s272_s5] ss:$0 sm:$0xff] }
   0x7   :  { %v184_v22 = vpop.eup %183 }
   0x8   :  { %v33_v4 = vld [vmem:[#allocation2] sm:$0xff]  ;;  %v100_v23 = vmul.f32 32.0, %v184_v22  ;;  %vm104_vm1 = vweird.f32 %v184_v22 }
   0x9   :  { %174 = vmatmul.msk.bf16.vlgmr.msra.gmra.mxu0 %vm28_vm0, %v175_v3  ;;  %v34_v7 = vld [vmem:[#allocation2 + $0x8] sm:$0xff] }
   0xa   :  { %v101_v24 = vsub.f32 1.0, %v100_v23 }
   0xc   :  { %v102_v25 = vmul.f32 %v184_v22, %v101_v24 }
   0xe   :  { %v103_v26 = vadd.f32 %v184_v22, %v102_v25 }
  0x10   :  { %v105_v27 = vsel %vm104_vm1, %v184_v22, %v103_v26 }
  0x86   :  { %v69_v5 = vpop.f32.mrf.mxu0 }
  0x87   :  { %v74_v6 = vadd.f32 %v69_v5, %v33_v4 }
  0x89   :  { %76 = vst.msk [vmem:[#allocation2] sm:$0xff] %vm28_vm0, %v74_v6 }
  0x8e   :  { %v71_v9 = vpop.f32.mrf.mxu0 }
  0x8f   :  { %v75_v10 = vadd.f32 %v71_v9, %v34_v7 }
  0x90   :  { %v81_v11 = vld [vmem:[#allocation2] sm:$0xff] }
  0x91   :  { %77 = vst.msk [vmem:[#allocation2 + $0x8] sm:$0xff] %vm28_vm0, %v75_v10  ;;  %v87_v13 = vadd.f32 %v180_v8, %v81_v11 }
  0x93   :  { %v91_v14 = vadd.f32 %v89_v12, %v87_v13 }
  0x95   :  { %v93_v15 = vsel %vm28_vm0, %v91_v14, 0.0 }
  0x96   :  { %94 = vadd.xlane.f32.xlu0 %v93_v15 }
  0x98   :  { %v82_v16 = vld [vmem:[#allocation2 + $0x8] sm:$0xff] }
  0x99   :  { %v88_v18 = vadd.f32 %v180_v8, %v82_v16 }
  0x9b   :  { %v92_v19 = vadd.f32 %v90_v17, %v88_v18 }
  0x9d   :  { %v96_v20 = vsel %vm28_vm0, %v92_v19, 0.0 }
  0x9e   :  { %97 = vadd.xlane.f32.xlu0 %v96_v20 }
 0x109   :  { %v95_v28 = vpop.xlane.xlu0 %94 }
 0x10a   :  { %v106_v29 = vmul.f32 %v105_v27, %v95_v28 }
 0x10c   :  { %v108_v30 = vsub.f32 %v91_v14, %v106_v29 }
 0x10e   :  { %v110_v31 = vmul.f32 %v108_v30, %v108_v30 }
 0x110   :  { %v112_v32 = vsel %vm28_vm0, %v110_v31, 0.0 }
 0x111   :  { %113 = vadd.xlane.f32.xlu1 %v112_v32  ;;  %v98_v33 = vpop.xlane.xlu0 %97 }
 0x112   :  { %v107_v34 = vmul.f32 %v105_v27, %v98_v33 }
 0x114   :  { %v109_v35 = vsub.f32 %v92_v19, %v107_v34 }
 0x116   :  { %v111_v36 = vmul.f32 %v109_v35, %v109_v35 }
 0x118   :  { %v115_v37 = vsel %vm28_vm0, %v111_v36, 0.0 }
 0x119   :  { %116 = vadd.xlane.f32.xlu1 %v115_v37 }
 0x184   :  { %v114_v38 = vpop.xlane.xlu1 %113 }
 0x185   :  { %v118_v39 = vmul.f32 %v114_v38, %v105_v27 }
 0x187   :  { %v120_v40 = vadd.f32 1e-05, %v118_v39 }
 0x189   :  { %185 = vrsqrt.f32 %v120_v40  ;;  %vm128_vm3 = vweird.f32 %v120_v40 }
 0x18c   :  { %v117_v41 = vpop.xlane.xlu1 %116 }
 0x18d   :  { %v119_v42 = vmul.f32 %v117_v41, %v105_v27 }
 0x18f   :  { %v186_v43 = vpop.eup %185  ;;  %v121_v44 = vadd.f32 1e-05, %v119_v42 }
 0x190   :  { %v123_v45 = vmul.f32 %v186_v43, %v120_v40  ;;  %vm129_vm2 = vweird.f32 %v186_v43 }
 0x191   :  { %187 = vrsqrt.f32 %v121_v44  ;;  %vm130_vm4 = vmor %vm128_vm3, %vm129_vm2  ;;  %vm138_vm6 = vweird.f32 %v121_v44 }
 0x192   :  { %v124_v46 = vmul.f32 %v186_v43, %v123_v45 }
 0x194   :  { %v125_v47 = vmul.f32 0.5, %v124_v46 }
 0x196   :  { %v126_v48 = vsub.f32 1.5, %v125_v47 }
 0x197   :  { %v188_v49 = vpop.eup %187 }
 0x198   :  { %v127_v50 = vmul.f32 %v186_v43, %v126_v48  ;;  %v133_v51 = vmul.f32 %v188_v49, %v121_v44  ;;  %vm139_vm5 = vweird.f32 %v188_v49 }
 0x199   :  { %vm140_vm7 = vmor %vm138_vm6, %vm139_vm5 }
 0x19a   :  { %v131_v53 = vsel %vm130_vm4, %v186_v43, %v127_v50  ;;  %v134_v54 = vmul.f32 %v188_v49, %v133_v51 }
 0x19b   :  { %v142_v56 = vmul.f32 %v131_v53, %v108_v30 }
 0x19c   :  { %v135_v57 = vmul.f32 0.5, %v134_v54 }
 0x19d   :  { %v148_v58 = vmul.f32 %v181_v52, %v142_v56 }
 0x19e   :  { %v136_v59 = vsub.f32 1.5, %v135_v57 }
 0x19f   :  { %v154_v60 = vadd.f32 %v182_v55, %v148_v58 }
 0x1a0   :  { %v137_v61 = vmul.f32 %v188_v49, %v136_v59 }
 0x1a1   :  { %156 = vst.msk [vmem:[%s273_s6] sm:$0xff] %vm28_vm0, %v154_v60 }
 0x1a2   :  { %v141_v62 = vsel %vm140_vm7, %v188_v49, %v137_v61 }
 0x1a3   :  { %v143_v63 = vmul.f32 %v141_v62, %v109_v35 }
 0x1a5   :  { %v149_v0 = vmul.f32 %v181_v52, %v143_v63 }
 0x1a7   :  { %v155_v1 = vadd.f32 %v182_v55, %v149_v0 }
 0x1a9   :  { %157 = vst.msk [vmem:[%s273_s6 + $0x8] sm:$0xff] %vm28_vm0, %v155_v1 }

// kernel: bert_forward.10
= control target key start
LH: loop header
LB: loop body
LE: loop exit
PB: predicated region body
PF: predicated region fallthrough
CT: control target
= control target key end

     0   :  { %8 = vsyncpa [#allocation4], 0  ;;  %s145_s15 = smov [#allocation3]   ;;  %s146_s17 = smov 128   ;;  %s191_s0 = inlined_call_operand.hbm [shape: f32[16,32], index: 0, kind: input, shape index: {}]   ;;  %s192_s1 = inlined_call_operand.vmem [shape: bf16[32,96], index: 1, kind: input, shape index: {}]   ;;  %s193_s2 = inlined_call_operand.vmem [shape: f32[1,96], index: 2, kind: input, shape index: {}]   ;;  %s194_s3 = inlined_call_operand.vmem [shape: bf16[16,96], index: 3, kind: output, shape index: {}]  }
   0x1   :  { %s13_s14 = sshll.u32 %s191_s0, 4  ;;  %s15_s16 = sshll.u32 %s145_s15, 4  ;;  %s14_s14 = int_to_ptr.hbm [resolvable:$true] %s13_s14  ;;  %s16_s16 = int_to_ptr.vmem [resolvable:$true] %s15_s16 }
   0x2   :  { %s147_s18 = smov 8  }
   0x3   :  { %21 = dma.hbm_to_vmem [thread:$0]  %s14_s14, 256, %s16_s16, [#allocation4], %s146_s17, %s146_s17, %s147_s18  }
   0x4   :  { %143 = dma.done.wait [#allocation4], 256  }
   0x5   :  { %144 = vsyncadd [#allocation4], 4294967040  ;;  %vm35_vm0 = vcmask 785408   ;;  %v148_v0 = vmov 0.0   ;;  %v113_v1 = vld [vmem:[%s192_s1 + $0x8] sm:$0xff]  ;;  %v112_v2 = vld [vmem:[%s192_s1] sm:$0xff] }
   0x6   :  { %36 = vst.msk [vmem:[#allocation2] sm:$0xff] %vm35_vm0, %v148_v0  ;;  %69 = vmatpush.bf16.msra.mxu0 %v113_v1  ;;  %v38_v3 = vld [vmem:[#allocation3] sm:$0xff]  ;;  %v39_v4 = vld [vmem:[#allocation3 + $0x8] sm:$0xff]  ;;  %vm59_vm1 = vcmask 261120   ;;  %v118_v10 = vld [vmem:[%s193_s2] ss:$0 sm:$0xff] }
   0x7   :  { %37 = vst.msk [vmem:[#allocation2 + $0x8] sm:$0xff] %vm35_vm0, %v148_v0  ;;  %v40_v5 = vpack.c.bf16 %v39_v4, %v38_v3  ;;  %vm95_vm2 = vcmask 781312  }
   0xa   :  { %70 = vmatpush.bf16.msra.mxu0 %v112_v2 }
   0xd   :  { %111 = vmatmul.msk.bf16.vlgmr.msra.gmra.mxu0 %vm59_vm1, %v40_v5  ;;  %v41_v6 = vld [vmem:[#allocation2] sm:$0xff] }
   0xe   :  { %v42_v9 = vld [vmem:[#allocation2 + $0x8] sm:$0xff] }
  0x8a   :  { %v72_v7 = vpop.f32.mrf.mxu0 }
  0x8b   :  { %v77_v8 = vadd.f32 %v72_v7, %v41_v6 }
  0x8d   :  { %80 = vst.msk [vmem:[#allocation2] sm:$0xff] %vm35_vm0, %v77_v8 }
  0x92   :  { %v74_v11 = vpop.f32.mrf.mxu0 }
  0x93   :  { %v78_v12 = vadd.f32 %v74_v11, %v42_v9 }
  0x94   :  { %v85_v13 = vld [vmem:[#allocation2] sm:$0xff] }
  0x95   :  { %v91_v14 = vadd.f32 %v118_v10, %v85_v13  ;;  %81 = vst.msk [vmem:[#allocation2 + $0x8] sm:$0xff] %vm35_vm0, %v78_v12 }
  0x97   :  { %v93_v15 = vpack.c.bf16 %v91_v14, %v91_v14 }
  0x99   :  { %96 = vst.msk [vmem:[%s194_s3] sm:$0xf] %vm95_vm2, %v93_v15 }
  0x9c   :  { %v86_v16 = vld [vmem:[#allocation2 + $0x8] sm:$0xff] }
  0x9d   :  { %v92_v17 = vadd.f32 %v118_v10, %v86_v16 }
  0x9f   :  { %v94_v18 = vpack.c.bf16 %v92_v17, %v92_v17 }
  0xa1   :  { %97 = vst.msk [vmem:[%s194_s3 + $0x4] sm:$0xf] %vm95_vm2, %v94_v18 }
  0xa2   :  { %102 = vsyncpa [#allocation4], 1 }

// kernel: bert_forward.15
= control target key start
LH: loop header
LB: loop body
LE: loop exit
PB: predicated region body
PF: predicated region fallthrough
CT: control target
= control target key end

     0   :  { %vm19_vm0 = vcmask 785408   ;;  %v99_v1 = vmov 0.0   ;;  %vm43_vm1 = vcmask 261120   ;;  %vm79_vm2 = vcmask 781312   ;;  %s145_s1 = inlined_call_operand.vmem [shape: bf16[32,96], index: 1, kind: input, shape index: {}]   ;;  %s146_s0 = inlined_call_operand.vmem [shape: f32[16,32], index: 0, kind: input, shape index: {}]   ;;  %s147_s2 = inlined_call_operand.vmem [shape: f32[1,96], index: 2, kind: input, shape index: {}]   ;;  %s148_s3 = inlined_call_operand.vmem [shape: bf16[16,96], index: 3, kind: output, shape index: {}]  }
   0x1   :  { %v96_v0 = vld [vmem:[%s145_s1 + $0x8] sm:$0xff]  ;;  %20 = vst.msk [vmem:[#allocation2] sm:$0xff] %vm19_vm0, %v99_v1  ;;  %v95_v2 = vld [vmem:[%s145_s1] sm:$0xff] }
   0x2   :  { %21 = vst.msk [vmem:[#allocation2 + $0x8] sm:$0xff] %vm19_vm0, %v99_v1  ;;  %53 = vmatpush.bf16.msra.mxu0 %v96_v0  ;;  %v22_v3 = vld [vmem:[%s146_s0] sm:$0xff]  ;;  %v23_v4 = vld [vmem:[%s146_s0 + $0x8] sm:$0xff] }
   0x3   :  { %v24_v5 = vpack.c.bf16 %v23_v4, %v22_v3  ;;  %v98_v10 = vld [vmem:[%s147_s2] ss:$0 sm:$0xff] }
   0x6   :  { %54 = vmatpush.bf16.msra.mxu0 %v95_v2 }
   0x8   :  { %v25_v6 = vld [vmem:[#allocation2] sm:$0xff] }
   0x9   :  { %94 = vmatmul.msk.bf16.vlgmr.msra.gmra.mxu0 %vm43_vm1, %v24_v5  ;;  %v26_v9 = vld [vmem:[#allocation2 + $0x8] sm:$0xff] }
  0x86   :  { %v56_v7 = vpop.f32.mrf.mxu0 }
  0x87   :  { %v61_v8 = vadd.f32 %v56_v7, %v25_v6 }
  0x89   :  { %64 = vst.msk [vmem:[#allocation2] sm:$0xff] %vm19_vm0, %v61_v8 }
  0x8e   :  { %v58_v11 = vpop.f32.mrf.mxu0 }
  0x8f   :  { %v62_v12 = vadd.f32 %v58_v11, %v26_v9 }
  0x90   :  { %v69_v13 = vld [vmem:[#allocation2] sm:$0xff] }
  0x91   :  { %v75_v14 = vadd.f32 %v98_v10, %v69_v13  ;;  %65 = vst.msk [vmem:[#allocation2 + $0x8] sm:$0xff] %vm19_vm0, %v62_v12 }
  0x93   :  { %v77_v15 = vpack.c.bf16 %v75_v14, %v75_v14 }
  0x95   :  { %80 = vst.msk [vmem:[%s148_s3] sm:$0xf] %vm79_vm2, %v77_v15 }
  0x98   :  { %v70_v16 = vld [vmem:[#allocation2 + $0x8] sm:$0xff] }
  0x99   :  { %v76_v17 = vadd.f32 %v98_v10, %v70_v16 }
  0x9b   :  { %v78_v18 = vpack.c.bf16 %v76_v17, %v76_v17 }
  0x9d   :  { %81 = vst.msk [vmem:[%s148_s3 + $0x4] sm:$0xf] %vm79_vm2, %v78_v18 }

// kernel: bert_forward.14
= control target key start
LH: loop header
LB: loop body
LE: loop exit
PB: predicated region body
PF: predicated region fallthrough
CT: control target
= control target key end

     0   :  { %vm28_vm0 = vcmask 261120   ;;  %v216_v1 = vmov 0.0   ;;  %vm72_vm1 = vcmask 523264   ;;  %v217_v23 = vmov 32.0   ;;  %s299_s1 = inlined_call_operand.vmem [shape: bf16[64,32], index: 1, kind: input, shape index: {}]   ;;  %s300_s0 = inlined_call_operand.vmem [shape: bf16[16,64], index: 0, kind: input, shape index: {}]   ;;  %s301_s2 = inlined_call_operand.vmem [shape: f32[1,32], index: 2, kind: input, shape index: {}]   ;;  %s302_s3 = inlined_call_operand.vmem [shape: f32[16,32], index: 3, kind: input, shape index: {}]   ;;  %s303_s4 = inlined_call_operand.vmem [shape: f32[1,32], index: 4, kind: input, shape index: {}]   ;;  %s304_s5 = inlined_call_operand.vmem [shape: f32[1,32], index: 5, kind: input, shape index: {}]   ;;  %s305_s6 = inlined_call_operand.vmem [shape: f32[16,32], index: 6, kind: output, shape index: {}]  }
   0x1   :  { %v204_v0 = vld [vmem:[%s299_s1 + $0x18] sm:$0xff]  ;;  %29 = vst.msk [vmem:[#allocation2] sm:$0xff] %vm28_vm0, %v216_v1  ;;  %v203_v2 = vld [vmem:[%s299_s1 + $0x10] sm:$0xff]  ;;  %v202_v3 = vld [vmem:[%s299_s1 + $0x8] sm:$0xff]  ;;  %210 = vrcp.f32 %v217_v23 }
   0x2   :  { %30 = vst.msk [vmem:[#allocation2 + $0x8] sm:$0xff] %vm28_vm0, %v216_v1  ;;  %80 = vmatpush.bf16.msra.mxu0 %v204_v0  ;;  %v201_v4 = vld [vmem:[%s299_s1] sm:$0xff]  ;;  %v107_v19 = vld [vmem:[%s302_s3 + $0x8] sm:$0xff] }
   0x3   :  { %v200_v5 = vld [vmem:[%s300_s0] sm:$0xff] }
   0x4   :  { %v207_v10 = vld [vmem:[%s301_s2] ss:$0 sm:$0xff] }
   0x5   :  { %v106_v14 = vld [vmem:[%s302_s3] sm:$0xff] }
   0x6   :  { %81 = vmatpush.bf16.msra.mxu0 %v203_v2  ;;  %v208_v54 = vld [vmem:[%s303_s4] ss:$0 sm:$0xff] }
   0x7   :  { %v211_v24 = vpop.eup %210  ;;  %v209_v57 = vld [vmem:[%s304_s5] ss:$0 sm:$0xff] }
   0x8   :  { %v33_v6 = vld [vmem:[#allocation2] sm:$0xff]  ;;  %v117_v25 = vmul.f32 32.0, %v211_v24  ;;  %vm121_vm2 = vweird.f32 %v211_v24 }
   0x9   :  { %v34_v9 = vld [vmem:[#allocation2 + $0x8] sm:$0xff] }
   0xa   :  { %82 = vmatpush.bf16.msra.mxu0 %v202_v3  ;;  %v118_v26 = vsub.f32 1.0, %v117_v25 }
   0xc   :  { %v119_v27 = vmul.f32 %v211_v24, %v118_v26 }
   0xe   :  { %83 = vmatpush.bf16.msra.mxu0 %v201_v4  ;;  %v120_v28 = vadd.f32 %v211_v24, %v119_v27 }
  0x10   :  { %v122_v29 = vsel %vm121_vm2, %v211_v24, %v120_v28 }
  0x11   :  { %199 = vmatmul.msk.bf16.vlgmr.msra.gmra.mxu0 %vm72_vm1, %v200_v5 }
  0x8e   :  { %v85_v7 = vpop.f32.mrf.mxu0 }
  0x8f   :  { %v90_v8 = vadd.f32 %v85_v7, %v33_v6 }
  0x91   :  { %93 = vst.msk [vmem:[#allocation2] sm:$0xff] %vm28_vm0, %v90_v8 }
  0x96   :  { %v87_v11 = vpop.f32.mrf.mxu0 }
  0x97   :  { %v91_v12 = vadd.f32 %v87_v11, %v34_v9 }
  0x98   :  { %v98_v13 = vld [vmem:[#allocation2] sm:$0xff] }
  0x99   :  { %94 = vst.msk [vmem:[#allocation2 + $0x8] sm:$0xff] %vm28_vm0, %v91_v12  ;;  %v104_v15 = vadd.f32 %v207_v10, %v98_v13 }
  0x9b   :  { %v108_v16 = vadd.f32 %v106_v14, %v104_v15 }
  0x9d   :  { %v110_v17 = vsel %vm28_vm0, %v108_v16, 0.0 }
  0x9e   :  { %111 = vadd.xlane.f32.xlu0 %v110_v17 }
  0xa0   :  { %v99_v18 = vld [vmem:[#allocation2 + $0x8] sm:$0xff] }
  0xa1   :  { %v105_v20 = vadd.f32 %v207_v10, %v99_v18 }
  0xa3   :  { %v109_v21 = vadd.f32 %v107_v19, %v105_v20 }
  0xa5   :  { %v113_v22 = vsel %vm28_vm0, %v109_v21, 0.0 }
  0xa6   :  { %114 = vadd.xlane.f32.xlu0 %v113_v22 }
 0x111   :  { %v112_v30 = vpop.xlane.xlu0 %111 }
 0x112   :  { %v123_v31 = vmul.f32 %v122_v29, %v112_v30 }
 0x114   :  { %v125_v32 = vsub.f32 %v108_v16, %v123_v31 }
 0x116   :  { %v127_v33 = vmul.f32 %v125_v32, %v125_v32 }
 0x118   :  { %v129_v34 = vsel %vm28_vm0, %v127_v33, 0.0 }
 0x119   :  { %130 = vadd.xlane.f32.xlu1 %v129_v34  ;;  %v115_v35 = vpop.xlane.xlu0 %114 }
 0x11a   :  { %v124_v36 = vmul.f32 %v122_v29, %v115_v35 }
 0x11c   :  { %v126_v37 = vsub.f32 %v109_v21, %v124_v36 }
 0x11e   :  { %v128_v38 = vmul.f32 %v126_v37, %v126_v37 }
 0x120   :  { %v132_v39 = vsel %vm28_vm0, %v128_v38, 0.0 }
 0x121   :  { %133 = vadd.xlane.f32.xlu1 %v132_v39 }
 0x18c   :  { %v131_v40 = vpop.xlane.xlu1 %130 }
 0x18d   :  { %v135_v41 = vmul.f32 %v131_v40, %v122_v29 }
 0x18f   :  { %v137_v42 = vadd.f32 1e-05, %v135_v41 }
 0x191   :  { %212 = vrsqrt.f32 %v137_v42  ;;  %vm145_vm4 = vweird.f32 %v137_v42 }
 0x194   :  { %v134_v43 = vpop.xlane.xlu1 %133 }
 0x195   :  { %v136_v44 = vmul.f32 %v134_v43, %v122_v29 }
 0x197   :  { %v213_v45 = vpop.eup %212  ;;  %v138_v46 = vadd.f32 1e-05, %v136_v44 }
 0x198   :  { %v140_v47 = vmul.f32 %v213_v45, %v137_v42  ;;  %vm146_vm3 = vweird.f32 %v213_v45 }
 0x199   :  { %214 = vrsqrt.f32 %v138_v46  ;;  %vm147_vm5 = vmor %vm145_vm4, %vm146_vm3  ;;  %vm155_vm7 = vweird.f32 %v138_v46 }
 0x19a   :  { %v141_v48 = vmul.f32 %v213_v45, %v140_v47 }
 0x19c   :  { %v142_v49 = vmul.f32 0.5, %v141_v48 }
 0x19e   :  { %v143_v50 = vsub.f32 1.5, %v142_v49 }
 0x19f   :  { %v215_v51 = vpop.eup %214 }
 0x1a0   :  { %v144_v52 = vmul.f32 %v213_v45, %v143_v50  ;;  %v150_v53 = vmul.f32 %v215_v51, %v138_v46  ;;  %vm156_vm6 = vweird.f32 %v215_v51 }
 0x1a1   :  { %vm157_vm8 = vmor %vm155_vm7, %vm156_vm6 }
 0x1a2   :  { %v148_v55 = vsel %vm147_vm5, %v213_v45, %v144_v52  ;;  %v151_v56 = vmul.f32 %v215_v51, %v150_v53 }
 0x1a3   :  { %v159_v58 = vmul.f32 %v148_v55, %v125_v32 }
 0x1a4   :  { %v152_v59 = vmul.f32 0.5, %v151_v56 }
 0x1a5   :  { %v165_v60 = vmul.f32 %v208_v54, %v159_v58 }
 0x1a6   :  { %v153_v61 = vsub.f32 1.5, %v152_v59 }
 0x1a7   :  { %v171_v62 = vadd.f32 %v209_v57, %v165_v60 }
 0x1a8   :  { %v154_v63 = vmul.f32 %v215_v51, %v153_v61 }
 0x1a9   :  { %173 = vst.msk [vmem:[%s305_s6] sm:$0xff] %vm28_vm0, %v171_v62 }
 0x1aa   :  { %v158_v0 = vsel %vm157_vm8, %v215_v51, %v154_v63 }
 0x1ab   :  { %v160_v1 = vmul.f32 %v158_v0, %v126_v37 }
 0x1ad   :  { %v166_v2 = vmul.f32 %v208_v54, %v160_v1 }
 0x1af   :  { %v172_v3 = vadd.f32 %v209_v57, %v166_v2 }
 0x1b1   :  { %174 = vst.msk [vmem:[%s305_s6 + $0x8] sm:$0xff] %vm28_vm0, %v172_v3 }

// kernel: bert_forward.19
= control target key start
LH: loop header
LB: loop body
LE: loop exit
PB: predicated region body
PF: predicated region fallthrough
CT: control target
= control target key end

     0   :  { %vm29_vm0 = vcmask 261120   ;;  %v260_v1 = vmov 0.0   ;;  %s343_s0 = inlined_call_operand.vmem [shape: bf16[16,64], index: 0, kind: input, shape index: {}]   ;;  %s344_s1 = inlined_call_operand.vmem [shape: bf16[64,32], index: 1, kind: input, shape index: {}]   ;;  %s345_s2 = inlined_call_operand.vmem [shape: f32[1,32], index: 2, kind: input, shape index: {}]   ;;  %s346_s3 = inlined_call_operand.vmem [shape: f32[16,32], index: 3, kind: input, shape index: {}]   ;;  %s347_s4 = inlined_call_operand.vmem [shape: f32[1,32], index: 4, kind: input, shape index: {}]   ;;  %s348_s5 = inlined_call_operand.vmem [shape: f32[1,32], index: 5, kind: input, shape index: {}]   ;;  %s349_s6 = inlined_call_operand.hbm [shape: f32[16,32], index: 6, kind: output, shape index: {}]  }
   0x1   :  { %v219_v0 = vld [vmem:[%s344_s1 + $0x18] sm:$0xff]  ;;  %30 = vst.msk [vmem:[#allocation2] sm:$0xff] %vm29_vm0, %v260_v1  ;;  %v218_v2 = vld [vmem:[%s344_s1 + $0x10] sm:$0xff] }
   0x2   :  { %81 = vmatpush.bf16.msra.mxu0 %v219_v0  ;;  %31 = vst.msk [vmem:[#allocation2 + $0x8] sm:$0xff] %vm29_vm0, %v260_v1 }
   0x3   :  { %11 = vsyncpa [#allocation4], 0  ;;  %v217_v3 = vld [vmem:[%s344_s1 + $0x8] sm:$0xff]  ;;  %v216_v4 = vld [vmem:[%s344_s1] sm:$0xff]  ;;  %vm73_vm1 = vcmask 523264   ;;  %v261_v23 = vmov 32.0  }
   0x4   :  { %v215_v5 = vld [vmem:[%s343_s0] sm:$0xff]  ;;  %v108_v19 = vld [vmem:[%s346_s3 + $0x8] sm:$0xff]  ;;  %228 = vrcp.f32 %v261_v23  ;;  %s182_s16 = sshll.u32 %s349_s6, 4  ;;  %s264_s17 = smov 8   ;;  %s183_s16 = int_to_ptr.hbm [resolvable:$true] %s182_s16 }
   0x5   :  { %v225_v10 = vld [vmem:[%s345_s2] ss:$0 sm:$0xff] }
   0x6   :  { %82 = vmatpush.bf16.msra.mxu0 %v218_v2  ;;  %v107_v14 = vld [vmem:[%s346_s3] sm:$0xff] }
   0x7   :  { %v226_v54 = vld [vmem:[%s347_s4] ss:$0 sm:$0xff]  ;;  %s262_s4 = smov [#allocation3]  }
   0x8   :  { %v34_v6 = vld [vmem:[#allocation2] sm:$0xff]  ;;  %s180_s13 = sshll.u32 %s262_s4, 4  ;;  %s181_s13 = int_to_ptr.vmem [resolvable:$true] %s180_s13 }
   0x9   :  { %v35_v9 = vld [vmem:[#allocation2 + $0x8] sm:$0xff]  ;;  %v227_v58 = vld [vmem:[%s348_s5] ss:$0 sm:$0xff]  ;;  %s263_s5 = smov 128  }
   0xa   :  { %83 = vmatpush.bf16.msra.mxu0 %v217_v3  ;;  %v229_v24 = vpop.eup %228 }
   0xb   :  { %v118_v25 = vmul.f32 32.0, %v229_v24  ;;  %vm122_vm2 = vweird.f32 %v229_v24 }
   0xd   :  { %v119_v26 = vsub.f32 1.0, %v118_v25 }
   0xe   :  { %84 = vmatpush.bf16.msra.mxu0 %v216_v4 }
   0xf   :  { %v120_v27 = vmul.f32 %v229_v24, %v119_v26 }
  0x11   :  { %214 = vmatmul.msk.bf16.vlgmr.msra.gmra.mxu0 %vm73_vm1, %v215_v5  ;;  %v121_v28 = vadd.f32 %v229_v24, %v120_v27 }
  0x13   :  { %v123_v29 = vsel %vm122_vm2, %v229_v24, %v121_v28 }
  0x8e   :  { %v86_v7 = vpop.f32.mrf.mxu0 }
  0x8f   :  { %v91_v8 = vadd.f32 %v86_v7, %v34_v6 }
  0x91   :  { %94 = vst.msk [vmem:[#allocation2] sm:$0xff] %vm29_vm0, %v91_v8 }
  0x96   :  { %v88_v11 = vpop.f32.mrf.mxu0 }
  0x97   :  { %v92_v12 = vadd.f32 %v88_v11, %v35_v9 }
  0x98   :  { %v99_v13 = vld [vmem:[#allocation2] sm:$0xff] }
  0x99   :  { %95 = vst.msk [vmem:[#allocation2 + $0x8] sm:$0xff] %vm29_vm0, %v92_v12  ;;  %v105_v15 = vadd.f32 %v225_v10, %v99_v13 }
  0x9b   :  { %v109_v16 = vadd.f32 %v107_v14, %v105_v15 }
  0x9d   :  { %v111_v17 = vsel %vm29_vm0, %v109_v16, 0.0 }
  0x9e   :  { %112 = vadd.xlane.f32.xlu0 %v111_v17 }
  0xa0   :  { %v100_v18 = vld [vmem:[#allocation2 + $0x8] sm:$0xff] }
  0xa1   :  { %v106_v20 = vadd.f32 %v225_v10, %v100_v18 }
  0xa3   :  { %v110_v21 = vadd.f32 %v108_v19, %v106_v20 }
  0xa5   :  { %v114_v22 = vsel %vm29_vm0, %v110_v21, 0.0 }
  0xa6   :  { %115 = vadd.xlane.f32.xlu0 %v114_v22 }
 0x111   :  { %v113_v30 = vpop.xlane.xlu0 %112 }
 0x112   :  { %v124_v31 = vmul.f32 %v123_v29, %v113_v30 }
 0x114   :  { %v126_v32 = vsub.f32 %v109_v16, %v124_v31 }
 0x116   :  { %v128_v33 = vmul.f32 %v126_v32, %v126_v32 }
 0x118   :  { %v130_v34 = vsel %vm29_vm0, %v128_v33, 0.0 }
 0x119   :  { %131 = vadd.xlane.f32.xlu1 %v130_v34  ;;  %v116_v35 = vpop.xlane.xlu0 %115 }
 0x11a   :  { %v125_v36 = vmul.f32 %v123_v29, %v116_v35 }
 0x11c   :  { %v127_v37 = vsub.f32 %v110_v21, %v125_v36 }
 0x11e   :  { %v129_v38 = vmul.f32 %v127_v37, %v127_v37 }
 0x120   :  { %v133_v39 = vsel %vm29_vm0, %v129_v38, 0.0 }
 0x121   :  { %134 = vadd.xlane.f32.xlu1 %v133_v39 }
 0x18c   :  { %v132_v40 = vpop.xlane.xlu1 %131 }
 0x18d   :  { %v136_v41 = vmul.f32 %v132_v40, %v123_v29 }
 0x18f   :  { %v138_v42 = vadd.f32 1e-05, %v136_v41 }
 0x191   :  { %230 = vrsqrt.f32 %v138_v42  ;;  %vm146_vm4 = vweird.f32 %v138_v42 }
 0x194   :  { %v135_v43 = vpop.xlane.xlu1 %134 }
 0x195   :  { %v137_v44 = vmul.f32 %v135_v43, %v123_v29 }
 0x197   :  { %v231_v45 = vpop.eup %230  ;;  %v139_v46 = vadd.f32 1e-05, %v137_v44 }
 0x198   :  { %v141_v47 = vmul.f32 %v231_v45, %v138_v42  ;;  %vm147_vm3 = vweird.f32 %v231_v45 }
 0x199   :  { %232 = vrsqrt.f32 %v139_v46  ;;  %vm148_vm5 = vmor %vm146_vm4, %vm147_vm3  ;;  %vm156_vm7 = vweird.f32 %v139_v46 }
 0x19a   :  { %v142_v48 = vmul.f32 %v231_v45, %v141_v47 }
 0x19c   :  { %v143_v49 = vmul.f32 0.5, %v142_v48 }
 0x19e   :  { %v144_v50 = vsub.f32 1.5, %v143_v49 }
 0x19f   :  { %v233_v51 = vpop.eup %232 }
 0x1a0   :  { %v145_v52 = vmul.f32 %v231_v45, %v144_v50  ;;  %v151_v53 = vmul.f32 %v233_v51, %v139_v46  ;;  %vm157_vm6 = vweird.f32 %v233_v51 }
 0x1a1   :  { %vm158_vm8 = vmor %vm156_vm7, %vm157_vm6 }
 0x1a2   :  { %v149_v55 = vsel %vm148_vm5, %v231_v45, %v145_v52  ;;  %v152_v56 = vmul.f32 %v233_v51, %v151_v53 }
 0x1a3   :  { %v160_v57 = vmul.f32 %v149_v55, %v126_v32 }
 0x1a4   :  { %v153_v59 = vmul.f32 0.5, %v152_v56 }
 0x1a5   :  { %v166_v60 = vmul.f32 %v226_v54, %v160_v57 }
 0x1a6   :  { %v154_v61 = vsub.f32 1.5, %v153_v59 }
 0x1a7   :  { %v172_v62 = vadd.f32 %v227_v58, %v166_v60 }
 0x1a8   :  { %v155_v63 = vmul.f32 %v233_v51, %v154_v61 }
 0x1a9   :  { %174 = vst.msk [vmem:[#allocation3] sm:$0xff] %vm29_vm0, %v172_v62 }
 0x1aa   :  { %v159_v0 = vsel %vm158_vm8, %v233_v51, %v155_v63 }
 0x1ab   :  { %v161_v1 = vmul.f32 %v159_v0, %v127_v37 }
 0x1ad   :  { %v167_v2 = vmul.f32 %v226_v54, %v161_v1 }
 0x1af   :  { %v173_v3 = vadd.f32 %v227_v58, %v167_v2 }
 0x1b1   :  { %175 = vst.msk [vmem:[#allocation3 + $0x8] sm:$0xff] %vm29_vm0, %v173_v3 }
 0x1b2   :  { %188 = dma.vmem_to_hbm [thread:$0]  %s181_s13, 256, %s183_s16, [#allocation4], %s263_s5, %s263_s5, %s264_s17  }
 0x1b3   :  { %258 = dma.done.wait [#allocation4], 256  }
 0x1b4   :  { %259 = vsyncadd [#allocation4], 4294967040 }
 0x1b5   :  { %193 = vsyncpa [#allocation4], 1 }

</bundles_post_ra>
